<compile_context>
chip_gen: v6e
topology: v6e:2x2x1
jax: 0.10.0
libtpu: 0.0.40
codegen_flags: <defaults>
</compile_context>

<pallas_src>
from functools import partial

import numpy as np
import jax
import jax.numpy as jnp
from jax import lax
from jax.experimental import pallas as pl
from jax.experimental.pallas import tpu as pltpu

NUM_LAYERS = 4
EMB_DIM = 64
IN_DIM = 5
OUT_DIM = 1

IN_PAD = 8          # lin_in fan-in padded to a sublane multiple
ROW_LIN_W = 0       # head slab rows (all 1-row vectors sublane-8 aligned)
ROW_LIN_B = 8
ROW_PRED_W = 16
ROW_PRED_B = 24
HEAD_ROWS = 32


def _round_up(v, m):
    return ((v + m - 1) // m) * m


def mpnn_kernel(x_ref, edge_ref, w1_ref, w2_ref, vec_ref, head_ref, out_ref,
                *, n_real):
    f32 = jnp.float32
    bf16 = jnp.bfloat16
    relu = lambda t: jnp.maximum(t, 0.0)

    n_pad = x_ref.shape[0]
    three_e = edge_ref.shape[0]
    n_edges = three_e // 3
    two_e = 2 * n_edges
    D = EMB_DIM

    # lin_in: [N, IN_PAD] @ [IN_PAD, D] + b   (padded rows/cols are zero)
    h = (jnp.dot(x_ref[...], head_ref[ROW_LIN_W:ROW_LIN_W + IN_PAD, :],
                 preferred_element_type=f32)
         + head_ref[ROW_LIN_B:ROW_LIN_B + 1, :])                    # [N, D] f32

    # Edge slab: rows [:E]=dst (targets / h_i / scatter idx), [E:2E]=src (h_j),
    # [2E:3E]=dists.  Indices travel as exact-integer f32; padded edges are -1.
    edata = edge_ref[...]                                           # [3E, 1] f32
    idx = edata[0:two_e].astype(jnp.int32)                          # [2E, 1]
    dists = edata[two_e:three_e]                                    # [E, 1] f32

    node_iota = lax.broadcasted_iota(jnp.int32, (two_e, n_pad), 1)
    oh = jnp.where(idx == node_iota, 1.0, 0.0).astype(bf16)         # [2E, N]
    dst_oh = oh[:n_edges]                                           # [E, N]

    for l in range(NUM_LAYERS):
        w1_l = w1_ref[l]          # [4D, D] bf16 (static leading index)
        w2_l = w2_ref[l]          # [2D, D] bf16
        vec_l = vec_ref[l]        # [5,  D] f32

        # --- fused gather: one bf16 matmul yields both h_i and h_j ---
        gathered = jnp.dot(oh, h.astype(bf16), preferred_element_type=f32)
        h_i = gathered[:n_edges]                                    # target nodes
        h_j = gathered[n_edges:]                                    # source nodes

        # --- message MLP (first layer fused over [h_i | h_j], dists rank-1) ---
        hij = jnp.concatenate([h_i, h_j], axis=-1).astype(bf16)     # [E, 2D]
        m = (jnp.dot(hij, w1_l[0:2 * D], preferred_element_type=f32)
             + dists * vec_l[0:1]
             + vec_l[1:2])
        m = relu(m)
        m = relu(jnp.dot(m.astype(bf16), w2_l[0:D], preferred_element_type=f32)
                 + vec_l[2:3])

        # --- aggregate: scatter-add by target node (transposed contraction) ---
        aggr = lax.dot_general(dst_oh, m.astype(bf16), (((0,), (0,)), ((), ())),
                               preferred_element_type=f32)          # [N, D]

        # --- update MLP (first layer fused over [h | aggr]) + residual ---
        hu = jnp.concatenate([h, aggr], axis=-1).astype(bf16)       # [N, 2D]
        u = relu(jnp.dot(hu, w1_l[2 * D:4 * D], preferred_element_type=f32)
                 + vec_l[3:4])
        u = relu(jnp.dot(u.astype(bf16), w2_l[D:2 * D], preferred_element_type=f32)
                 + vec_l[4:5])
        h = h + u

    # global_mean_pool (single graph) over the real (unpadded) nodes.
    if n_real == n_pad:
        pooled = jnp.sum(h, axis=0, keepdims=True) * (1.0 / n_real)
    else:
        row_iota = lax.broadcasted_iota(jnp.int32, h.shape, 0)
        pooled = jnp.sum(jnp.where(row_iota < n_real, h, 0.0),
                         axis=0, keepdims=True) * (1.0 / n_real)

    pw = head_ref[ROW_PRED_W:ROW_PRED_W + 1, :]                     # [1, D]
    pb = head_ref[ROW_PRED_B:ROW_PRED_B + 1, 0:1]                   # [1, 1]
    out_ref[...] = jnp.sum(pooled * pw, axis=-1, keepdims=True) + pb


def pack_params(p):
    """Pack per-layer params into layer-leading slabs (one DMA each).

    w1: [L, 4D, D] bf16   rows 0:2D = fused msg first layer (h_i | h_j),
                          rows 2D:4D = fused upd first layer (h | aggr)
    w2: [L, 2D, D] bf16   rows 0:D = msg second layer, D:2D = upd second layer
    vec:[L, 5, D]  f32    rows: dists-weight, msg_b1, msg_b2, upd_b1, upd_b2
    head:[32, D]   f32    lin_in_w (rows 0:8, zero padded), lin_in_b @8,
                          pred_w @16, pred_b @24 (all sublane-aligned)."""
    D = EMB_DIM
    bf16 = jnp.bfloat16

    w1_slab = jnp.concatenate(
        [p['msg_w1a'], p['msg_w1b'], p['upd_w1a'], p['upd_w1b']],
        axis=1).astype(bf16)                                        # [L, 4D, D]
    w2_slab = jnp.concatenate(
        [p['msg_w2'], p['upd_w2']], axis=1).astype(bf16)            # [L, 2D, D]
    vec_slab = jnp.concatenate(
        [p['msg_w1d'], p['msg_b1'], p['msg_b2'], p['upd_b1'], p['upd_b2']],
        axis=1).astype(jnp.float32)                                 # [L, 5, D]

    head = jnp.zeros((HEAD_ROWS, D), jnp.float32)
    head = head.at[ROW_LIN_W:ROW_LIN_W + IN_DIM, :].set(p['lin_in_w'])
    head = head.at[ROW_LIN_B:ROW_LIN_B + 1, :].set(p['lin_in_b'])
    head = head.at[ROW_PRED_W:ROW_PRED_W + 1, :].set(jnp.transpose(p['pred_w']))
    head = head.at[ROW_PRED_B:ROW_PRED_B + 1, :].set(
        jnp.broadcast_to(p['pred_b'][:, :1], (1, D)))
    return w1_slab, w2_slab, vec_slab, head


def invariant_value_network(x, edge_index, dists, params):
    """x: [N, in_dim] f32, edge_index: [2, E] int32 (row 0 = src, row 1 = dst),
    dists: [E, 1] f32. Returns [num_graphs] (single graph -> shape (1,))."""
    n_real, in_dim = x.shape
    n_edges = edge_index.shape[1]

    # Pad nodes to a multiple of 8 rows and the input feature dim to 8 cols.
    n_pad = _round_up(max(n_real, 8), 8)
    x_p = jnp.zeros((n_pad, IN_PAD), jnp.float32)
    x_p = x_p.at[:n_real, :in_dim].set(x.astype(jnp.float32))

    # Pad edges to a multiple of 16 (bf16 sublane packing). Padded edges use
    # index -1 (matches no node -> all-zero one-hot row) and dist 0.
    e_pad = _round_up(max(n_edges, 16), 16)
    dst = jnp.full((e_pad,), -1, jnp.int32).at[:n_edges].set(
        edge_index[1].astype(jnp.int32))
    src = jnp.full((e_pad,), -1, jnp.int32).at[:n_edges].set(
        edge_index[0].astype(jnp.int32))
    d_p = jnp.zeros((e_pad,), jnp.float32).at[:n_edges].set(
        dists.reshape(-1).astype(jnp.float32))
    # One fused edge slab: [dst | src | dists] as a [3E, 1] f32 column.
    edge_slab = jnp.concatenate(
        [dst.astype(jnp.float32), src.astype(jnp.float32), d_p]
    ).reshape(3 * e_pad, 1)

    w1_slab, w2_slab, vec_slab, head_slab = pack_params(params)
    inputs = (x_p, edge_slab, w1_slab, w2_slab, vec_slab, head_slab)

    out = pl.pallas_call(
        partial(mpnn_kernel, n_real=n_real),
        out_shape=jax.ShapeDtypeStruct((1, OUT_DIM), jnp.float32),
        in_specs=[pl.BlockSpec(memory_space=pltpu.MemorySpace.VMEM)] * len(inputs),
        out_specs=pl.BlockSpec(memory_space=pltpu.MemorySpace.VMEM),
    )(*inputs)
    return out.reshape(-1)   # mimics out.view(-1)


def _linear_init(key, fan_in, fan_out):
    """Deterministic init matching nn.Linear shapes (stored as [in, out])."""
    kw, kb = jax.random.split(key)
    bound = 1.0 / np.sqrt(fan_in)
    w = jax.random.uniform(kw, (fan_in, fan_out), jnp.float32, -bound, bound)
    b = jax.random.uniform(kb, (1, fan_out), jnp.float32, -bound, bound)
    return w, b


def init_params(key):
    k_in, k_pred, *k_layers = jax.random.split(key, 2 + NUM_LAYERS)
    p = {}
    p['lin_in_w'], p['lin_in_b'] = _linear_init(k_in, IN_DIM, EMB_DIM)

    mw1a, mw1b, mw1d, mb1, mw2, mb2 = [], [], [], [], [], []
    uw1a, uw1b, ub1, uw2, ub2 = [], [], [], [], []
    for kl in k_layers:
        k1, k2, k3, k4 = jax.random.split(kl, 4)
        w1, b1 = _linear_init(k1, 2 * EMB_DIM + 1, EMB_DIM)   # mlp_msg[0]
        mw1a.append(w1[:EMB_DIM])
        mw1b.append(w1[EMB_DIM:2 * EMB_DIM])
        mw1d.append(w1[2 * EMB_DIM:])                         # [1, EMB_DIM]
        mb1.append(b1)
        w2, b2 = _linear_init(k2, EMB_DIM, EMB_DIM)           # mlp_msg[2]
        mw2.append(w2); mb2.append(b2)
        w3, b3 = _linear_init(k3, 2 * EMB_DIM, EMB_DIM)       # mlp_upd[0]
        uw1a.append(w3[:EMB_DIM]); uw1b.append(w3[EMB_DIM:]); ub1.append(b3)
        w4, b4 = _linear_init(k4, EMB_DIM, EMB_DIM)           # mlp_upd[2]
        uw2.append(w4); ub2.append(b4)

    p['msg_w1a'] = jnp.stack(mw1a); p['msg_w1b'] = jnp.stack(mw1b)
    p['msg_w1d'] = jnp.stack(mw1d); p['msg_b1'] = jnp.stack(mb1)
    p['msg_w2'] = jnp.stack(mw2);   p['msg_b2'] = jnp.stack(mb2)
    p['upd_w1a'] = jnp.stack(uw1a); p['upd_w1b'] = jnp.stack(uw1b)
    p['upd_b1'] = jnp.stack(ub1)
    p['upd_w2'] = jnp.stack(uw2);   p['upd_b2'] = jnp.stack(ub2)
    p['pred_w'], p['pred_b'] = _linear_init(k_pred, EMB_DIM, OUT_DIM)
    return p


def reference_forward(x, edge_index, dists, p):
    """Pure-JAX reference reproducing the PyTorch/PyG semantics, with matmul
    operands rounded to bf16 (f32 accumulate) to match the kernel's MXU path."""
    relu = lambda t: jnp.maximum(t, 0.0)
    f32, bf16 = jnp.float32, jnp.bfloat16

    def bdot(a, b):
        return jnp.dot(a.astype(bf16), b.astype(bf16), preferred_element_type=f32)

    n_nodes = x.shape[0]
    src, dst = edge_index[0], edge_index[1]
    h = x @ p['lin_in_w'] + p['lin_in_b']
    for l in range(NUM_LAYERS):
        h_j = h[src]          # source nodes (edge_index[0])
        h_i = h[dst]          # target nodes (edge_index[1])
        m = relu(bdot(jnp.concatenate([h_i, h_j], axis=-1),
                      jnp.concatenate([p['msg_w1a'][l], p['msg_w1b'][l]], axis=0))
                 + dists * p['msg_w1d'][l] + p['msg_b1'][l])
        m = relu(bdot(m, p['msg_w2'][l]) + p['msg_b2'][l])
        aggr = jax.ops.segment_sum(m.astype(bf16).astype(f32), dst,
                                   num_segments=n_nodes)
        u = relu(bdot(jnp.concatenate([h, aggr], axis=-1),
                      jnp.concatenate([p['upd_w1a'][l], p['upd_w1b'][l]], axis=0))
                 + p['upd_b1'][l])
        u = relu(bdot(u, p['upd_w2'][l]) + p['upd_b2'][l])
        h = h + u
    pooled = jnp.mean(h, axis=0, keepdims=True)
    return (pooled @ p['pred_w'] + p['pred_b']).reshape(-1)


if __name__ == "__main__":
    key = jax.random.PRNGKey(0)
    k_x, k_e, k_d, k_p = jax.random.split(key, 4)

    N_NODES, N_EDGES = 8, 16
    x = jax.random.normal(k_x, (N_NODES, IN_DIM), jnp.float32)
    edge_index = jax.random.randint(k_e, (2, N_EDGES), 0, N_NODES, jnp.int32)
    dists = jax.random.uniform(k_d, (N_EDGES, 1), jnp.float32)
    params = init_params(k_p)

    out = invariant_value_network(x, edge_index, dists, params)
    out = jax.block_until_ready(out)

    ref = reference_forward(x, edge_index, dists, params)
    if not np.allclose(np.asarray(out), np.asarray(ref), rtol=1e-3, atol=1e-3):
        raise AssertionError(f"mismatch: kernel={out} ref={ref}")

    print("KERNEL_OK")
</pallas_src>

<mosaic_0001>
module attributes {stable_mosaic.version = 11 : i64} {
  func.func @mpnn_kernel(%arg0: memref<8x8xf32, #tpu.memory_space<vmem>>, %arg1: memref<48x1xf32, #tpu.memory_space<vmem>>, %arg2: memref<4x256x64xbf16, #tpu.memory_space<vmem>>, %arg3: memref<4x128x64xbf16, #tpu.memory_space<vmem>>, %arg4: memref<4x5x64xf32, #tpu.memory_space<vmem>>, %arg5: memref<32x64xf32, #tpu.memory_space<vmem>>, %arg6: memref<1x1xf32, #tpu.memory_space<vmem>>) attributes {dimension_semantics = [], scalar_prefetch = 0 : i64, scratch_operands = 0 : i64, tpu.core_type = #tpu.core_type<tc>} {
    %c0 = arith.constant 0 : index
    %c0_0 = arith.constant 0 : index
    %0 = vector.load %arg0[%c0, %c0_0] : memref<8x8xf32, #tpu.memory_space<vmem>>, vector<8x8xf32>
    %c0_1 = arith.constant 0 : index
    %c0_2 = arith.constant 0 : index
    %1 = vector.load %arg5[%c0_1, %c0_2] : memref<32x64xf32, #tpu.memory_space<vmem>>, vector<8x64xf32>
    %cst = arith.constant dense<0.000000e+00> : vector<8x64xf32>
    %2 = tpu.matmul %0, %1, %cst {dimension_numbers = #tpu.dot_dimension_numbers<[1], [0], [0], [1], [0, 0, 1, 1], [], []>} : vector<8x8xf32>, vector<8x64xf32>, vector<8x64xf32> -> vector<8x64xf32>
    %c8 = arith.constant 8 : index
    %c0_3 = arith.constant 0 : index
    %3 = vector.load %arg5[%c8, %c0_3] : memref<32x64xf32, #tpu.memory_space<vmem>>, vector<1x64xf32>
    %4 = vector.broadcast %3 : vector<1x64xf32> to vector<8x64xf32>
    %5 = arith.addf %2, %4 : vector<8x64xf32>
    %c0_4 = arith.constant 0 : index
    %c0_5 = arith.constant 0 : index
    %6 = vector.load %arg1[%c0_4, %c0_5] : memref<48x1xf32, #tpu.memory_space<vmem>>, vector<48x1xf32>
    %7 = vector.extract_strided_slice %6 {offsets = [0, 0], sizes = [32, 1], strides = [1, 1]} : vector<48x1xf32> to vector<32x1xf32>
    %8 = arith.fptosi %7 : vector<32x1xf32> to vector<32x1xi32>
    %9 = vector.extract_strided_slice %6 {offsets = [32, 0], sizes = [16, 1], strides = [1, 1]} : vector<48x1xf32> to vector<16x1xf32>
    %10 = tpu.iota {dimensions = array<i32: 1>} : vector<32x8xi32>
    %11 = vector.broadcast %8 : vector<32x1xi32> to vector<32x8xi32>
    %12 = arith.cmpi eq, %11, %10 : vector<32x8xi32>
    %cst_6 = arith.constant 1.000000e+00 : f32
    %cst_7 = arith.constant 0.000000e+00 : f32
    %13 = vector.broadcast %cst_6 : f32 to vector<32x8xf32>
    %14 = vector.broadcast %cst_7 : f32 to vector<32x8xf32>
    %15 = arith.select %12, %13, %14 : vector<32x8xi1>, vector<32x8xf32>
    %16 = arith.truncf %15 : vector<32x8xf32> to vector<32x8xbf16>
    %17 = vector.extract_strided_slice %16 {offsets = [0, 0], sizes = [16, 8], strides = [1, 1]} : vector<32x8xbf16> to vector<16x8xbf16>
    %c0_8 = arith.constant 0 : index
    %c0_9 = arith.constant 0 : index
    %c0_10 = arith.constant 0 : index
    %18 = vector.load %arg2[%c0_8, %c0_9, %c0_10] : memref<4x256x64xbf16, #tpu.memory_space<vmem>>, vector<1x256x64xbf16>
    %19 = vector.shape_cast %18 : vector<1x256x64xbf16> to vector<256x64xbf16>
    %c0_11 = arith.constant 0 : index
    %c0_12 = arith.constant 0 : index
    %c0_13 = arith.constant 0 : index
    %20 = vector.load %arg3[%c0_11, %c0_12, %c0_13] : memref<4x128x64xbf16, #tpu.memory_space<vmem>>, vector<1x128x64xbf16>
    %21 = vector.shape_cast %20 : vector<1x128x64xbf16> to vector<128x64xbf16>
    %c0_14 = arith.constant 0 : index
    %c0_15 = arith.constant 0 : index
    %c0_16 = arith.constant 0 : index
    %22 = vector.load %arg4[%c0_14, %c0_15, %c0_16] : memref<4x5x64xf32, #tpu.memory_space<vmem>>, vector<1x5x64xf32>
    %23 = vector.shape_cast %22 : vector<1x5x64xf32> to vector<5x64xf32>
    %24 = arith.truncf %5 : vector<8x64xf32> to vector<8x64xbf16>
    %cst_17 = arith.constant dense<0.000000e+00> : vector<32x64xf32>
    %25 = tpu.matmul %16, %24, %cst_17 {dimension_numbers = #tpu.dot_dimension_numbers<[1], [0], [0], [1], [0, 0, 1, 1], [], []>} : vector<32x8xbf16>, vector<8x64xbf16>, vector<32x64xf32> -> vector<32x64xf32>
    %26 = vector.extract_strided_slice %25 {offsets = [0, 0], sizes = [16, 64], strides = [1, 1]} : vector<32x64xf32> to vector<16x64xf32>
    %27 = vector.extract_strided_slice %25 {offsets = [16, 0], sizes = [16, 64], strides = [1, 1]} : vector<32x64xf32> to vector<16x64xf32>
    %28 = tpu.concatenate %26, %27 in 1 : vector<16x64xf32>, vector<16x64xf32> -> vector<16x128xf32>
    %29 = arith.truncf %28 : vector<16x128xf32> to vector<16x128xbf16>
    %30 = vector.extract_strided_slice %19 {offsets = [0, 0], sizes = [128, 64], strides = [1, 1]} : vector<256x64xbf16> to vector<128x64xbf16>
    %cst_18 = arith.constant dense<0.000000e+00> : vector<16x64xf32>
    %31 = tpu.matmul %29, %30, %cst_18 {dimension_numbers = #tpu.dot_dimension_numbers<[1], [0], [0], [1], [0, 0, 1, 1], [], []>} : vector<16x128xbf16>, vector<128x64xbf16>, vector<16x64xf32> -> vector<16x64xf32>
    %32 = vector.extract_strided_slice %23 {offsets = [0, 0], sizes = [1, 64], strides = [1, 1]} : vector<5x64xf32> to vector<1x64xf32>
    %33 = vector.broadcast %9 : vector<16x1xf32> to vector<16x64xf32>
    %34 = vector.broadcast %32 : vector<1x64xf32> to vector<16x64xf32>
    %35 = arith.mulf %33, %34 : vector<16x64xf32>
    %36 = arith.addf %31, %35 : vector<16x64xf32>
    %37 = vector.extract_strided_slice %23 {offsets = [1, 0], sizes = [1, 64], strides = [1, 1]} : vector<5x64xf32> to vector<1x64xf32>
    %38 = vector.broadcast %37 : vector<1x64xf32> to vector<16x64xf32>
    %39 = arith.addf %36, %38 : vector<16x64xf32>
    %cst_19 = arith.constant 0.000000e+00 : f32
    %40 = vector.broadcast %cst_19 : f32 to vector<16x64xf32>
    %41 = arith.maximumf %39, %40 : vector<16x64xf32>
    %42 = arith.truncf %41 : vector<16x64xf32> to vector<16x64xbf16>
    %43 = vector.extract_strided_slice %21 {offsets = [0, 0], sizes = [64, 64], strides = [1, 1]} : vector<128x64xbf16> to vector<64x64xbf16>
    %cst_20 = arith.constant dense<0.000000e+00> : vector<16x64xf32>
    %44 = tpu.matmul %42, %43, %cst_20 {dimension_numbers = #tpu.dot_dimension_numbers<[1], [0], [0], [1], [0, 0, 1, 1], [], []>} : vector<16x64xbf16>, vector<64x64xbf16>, vector<16x64xf32> -> vector<16x64xf32>
    %45 = vector.extract_strided_slice %23 {offsets = [2, 0], sizes = [1, 64], strides = [1, 1]} : vector<5x64xf32> to vector<1x64xf32>
    %46 = vector.broadcast %45 : vector<1x64xf32> to vector<16x64xf32>
    %47 = arith.addf %44, %46 : vector<16x64xf32>
    %cst_21 = arith.constant 0.000000e+00 : f32
    %48 = vector.broadcast %cst_21 : f32 to vector<16x64xf32>
    %49 = arith.maximumf %47, %48 : vector<16x64xf32>
    %50 = arith.truncf %49 : vector<16x64xf32> to vector<16x64xbf16>
    %cst_22 = arith.constant dense<0.000000e+00> : vector<8x64xf32>
    %51 = tpu.matmul %17, %50, %cst_22 {dimension_numbers = #tpu.dot_dimension_numbers<[0], [0], [1], [1], [0, 1, 1, 1], [], []>} : vector<16x8xbf16>, vector<16x64xbf16>, vector<8x64xf32> -> vector<8x64xf32>
    %52 = tpu.concatenate %5, %51 in 1 : vector<8x64xf32>, vector<8x64xf32> -> vector<8x128xf32>
    %53 = arith.truncf %52 : vector<8x128xf32> to vector<8x128xbf16>
    %54 = vector.extract_strided_slice %19 {offsets = [128, 0], sizes = [128, 64], strides = [1, 1]} : vector<256x64xbf16> to vector<128x64xbf16>
    %cst_23 = arith.constant dense<0.000000e+00> : vector<8x64xf32>
    %55 = tpu.matmul %53, %54, %cst_23 {dimension_numbers = #tpu.dot_dimension_numbers<[1], [0], [0], [1], [0, 0, 1, 1], [], []>} : vector<8x128xbf16>, vector<128x64xbf16>, vector<8x64xf32> -> vector<8x64xf32>
    %56 = vector.extract_strided_slice %23 {offsets = [3, 0], sizes = [1, 64], strides = [1, 1]} : vector<5x64xf32> to vector<1x64xf32>
    %57 = vector.broadcast %56 : vector<1x64xf32> to vector<8x64xf32>
    %58 = arith.addf %55, %57 : vector<8x64xf32>
    %cst_24 = arith.constant 0.000000e+00 : f32
    %59 = vector.broadcast %cst_24 : f32 to vector<8x64xf32>
    %60 = arith.maximumf %58, %59 : vector<8x64xf32>
    %61 = arith.truncf %60 : vector<8x64xf32> to vector<8x64xbf16>
    %62 = vector.extract_strided_slice %21 {offsets = [64, 0], sizes = [64, 64], strides = [1, 1]} : vector<128x64xbf16> to vector<64x64xbf16>
    %cst_25 = arith.constant dense<0.000000e+00> : vector<8x64xf32>
    %63 = tpu.matmul %61, %62, %cst_25 {dimension_numbers = #tpu.dot_dimension_numbers<[1], [0], [0], [1], [0, 0, 1, 1], [], []>} : vector<8x64xbf16>, vector<64x64xbf16>, vector<8x64xf32> -> vector<8x64xf32>
    %64 = vector.extract_strided_slice %23 {offsets = [4, 0], sizes = [1, 64], strides = [1, 1]} : vector<5x64xf32> to vector<1x64xf32>
    %65 = vector.broadcast %64 : vector<1x64xf32> to vector<8x64xf32>
    %66 = arith.addf %63, %65 : vector<8x64xf32>
    %cst_26 = arith.constant 0.000000e+00 : f32
    %67 = vector.broadcast %cst_26 : f32 to vector<8x64xf32>
    %68 = arith.maximumf %66, %67 : vector<8x64xf32>
    %69 = arith.addf %5, %68 : vector<8x64xf32>
    %c1 = arith.constant 1 : index
    %c0_27 = arith.constant 0 : index
    %c0_28 = arith.constant 0 : index
    %70 = vector.load %arg2[%c1, %c0_27, %c0_28] : memref<4x256x64xbf16, #tpu.memory_space<vmem>>, vector<1x256x64xbf16>
    %71 = vector.shape_cast %70 : vector<1x256x64xbf16> to vector<256x64xbf16>
    %c1_29 = arith.constant 1 : index
    %c0_30 = arith.constant 0 : index
    %c0_31 = arith.constant 0 : index
    %72 = vector.load %arg3[%c1_29, %c0_30, %c0_31] : memref<4x128x64xbf16, #tpu.memory_space<vmem>>, vector<1x128x64xbf16>
    %73 = vector.shape_cast %72 : vector<1x128x64xbf16> to vector<128x64xbf16>
    %c1_32 = arith.constant 1 : index
    %c0_33 = arith.constant 0 : index
    %c0_34 = arith.constant 0 : index
    %74 = vector.load %arg4[%c1_32, %c0_33, %c0_34] : memref<4x5x64xf32, #tpu.memory_space<vmem>>, vector<1x5x64xf32>
    %75 = vector.shape_cast %74 : vector<1x5x64xf32> to vector<5x64xf32>
    %76 = arith.truncf %69 : vector<8x64xf32> to vector<8x64xbf16>
    %cst_35 = arith.constant dense<0.000000e+00> : vector<32x64xf32>
    %77 = tpu.matmul %16, %76, %cst_35 {dimension_numbers = #tpu.dot_dimension_numbers<[1], [0], [0], [1], [0, 0, 1, 1], [], []>} : vector<32x8xbf16>, vector<8x64xbf16>, vector<32x64xf32> -> vector<32x64xf32>
    %78 = vector.extract_strided_slice %77 {offsets = [0, 0], sizes = [16, 64], strides = [1, 1]} : vector<32x64xf32> to vector<16x64xf32>
    %79 = vector.extract_strided_slice %77 {offsets = [16, 0], sizes = [16, 64], strides = [1, 1]} : vector<32x64xf32> to vector<16x64xf32>
    %80 = tpu.concatenate %78, %79 in 1 : vector<16x64xf32>, vector<16x64xf32> -> vector<16x128xf32>
    %81 = arith.truncf %80 : vector<16x128xf32> to vector<16x128xbf16>
    %82 = vector.extract_strided_slice %71 {offsets = [0, 0], sizes = [128, 64], strides = [1, 1]} : vector<256x64xbf16> to vector<128x64xbf16>
    %cst_36 = arith.constant dense<0.000000e+00> : vector<16x64xf32>
    %83 = tpu.matmul %81, %82, %cst_36 {dimension_numbers = #tpu.dot_dimension_numbers<[1], [0], [0], [1], [0, 0, 1, 1], [], []>} : vector<16x128xbf16>, vector<128x64xbf16>, vector<16x64xf32> -> vector<16x64xf32>
    %84 = vector.extract_strided_slice %75 {offsets = [0, 0], sizes = [1, 64], strides = [1, 1]} : vector<5x64xf32> to vector<1x64xf32>
    %85 = vector.broadcast %9 : vector<16x1xf32> to vector<16x64xf32>
    %86 = vector.broadcast %84 : vector<1x64xf32> to vector<16x64xf32>
    %87 = arith.mulf %85, %86 : vector<16x64xf32>
    %88 = arith.addf %83, %87 : vector<16x64xf32>
    %89 = vector.extract_strided_slice %75 {offsets = [1, 0], sizes = [1, 64], strides = [1, 1]} : vector<5x64xf32> to vector<1x64xf32>
    %90 = vector.broadcast %89 : vector<1x64xf32> to vector<16x64xf32>
    %91 = arith.addf %88, %90 : vector<16x64xf32>
    %cst_37 = arith.constant 0.000000e+00 : f32
    %92 = vector.broadcast %cst_37 : f32 to vector<16x64xf32>
    %93 = arith.maximumf %91, %92 : vector<16x64xf32>
    %94 = arith.truncf %93 : vector<16x64xf32> to vector<16x64xbf16>
    %95 = vector.extract_strided_slice %73 {offsets = [0, 0], sizes = [64, 64], strides = [1, 1]} : vector<128x64xbf16> to vector<64x64xbf16>
    %cst_38 = arith.constant dense<0.000000e+00> : vector<16x64xf32>
    %96 = tpu.matmul %94, %95, %cst_38 {dimension_numbers = #tpu.dot_dimension_numbers<[1], [0], [0], [1], [0, 0, 1, 1], [], []>} : vector<16x64xbf16>, vector<64x64xbf16>, vector<16x64xf32> -> vector<16x64xf32>
    %97 = vector.extract_strided_slice %75 {offsets = [2, 0], sizes = [1, 64], strides = [1, 1]} : vector<5x64xf32> to vector<1x64xf32>
    %98 = vector.broadcast %97 : vector<1x64xf32> to vector<16x64xf32>
    %99 = arith.addf %96, %98 : vector<16x64xf32>
    %cst_39 = arith.constant 0.000000e+00 : f32
    %100 = vector.broadcast %cst_39 : f32 to vector<16x64xf32>
    %101 = arith.maximumf %99, %100 : vector<16x64xf32>
    %102 = arith.truncf %101 : vector<16x64xf32> to vector<16x64xbf16>
    %cst_40 = arith.constant dense<0.000000e+00> : vector<8x64xf32>
    %103 = tpu.matmul %17, %102, %cst_40 {dimension_numbers = #tpu.dot_dimension_numbers<[0], [0], [1], [1], [0, 1, 1, 1], [], []>} : vector<16x8xbf16>, vector<16x64xbf16>, vector<8x64xf32> -> vector<8x64xf32>
    %104 = tpu.concatenate %69, %103 in 1 : vector<8x64xf32>, vector<8x64xf32> -> vector<8x128xf32>
    %105 = arith.truncf %104 : vector<8x128xf32> to vector<8x128xbf16>
    %106 = vector.extract_strided_slice %71 {offsets = [128, 0], sizes = [128, 64], strides = [1, 1]} : vector<256x64xbf16> to vector<128x64xbf16>
    %cst_41 = arith.constant dense<0.000000e+00> : vector<8x64xf32>
    %107 = tpu.matmul %105, %106, %cst_41 {dimension_numbers = #tpu.dot_dimension_numbers<[1], [0], [0], [1], [0, 0, 1, 1], [], []>} : vector<8x128xbf16>, vector<128x64xbf16>, vector<8x64xf32> -> vector<8x64xf32>
    %108 = vector.extract_strided_slice %75 {offsets = [3, 0], sizes = [1, 64], strides = [1, 1]} : vector<5x64xf32> to vector<1x64xf32>
    %109 = vector.broadcast %108 : vector<1x64xf32> to vector<8x64xf32>
    %110 = arith.addf %107, %109 : vector<8x64xf32>
    %cst_42 = arith.constant 0.000000e+00 : f32
    %111 = vector.broadcast %cst_42 : f32 to vector<8x64xf32>
    %112 = arith.maximumf %110, %111 : vector<8x64xf32>
    %113 = arith.truncf %112 : vector<8x64xf32> to vector<8x64xbf16>
    %114 = vector.extract_strided_slice %73 {offsets = [64, 0], sizes = [64, 64], strides = [1, 1]} : vector<128x64xbf16> to vector<64x64xbf16>
    %cst_43 = arith.constant dense<0.000000e+00> : vector<8x64xf32>
    %115 = tpu.matmul %113, %114, %cst_43 {dimension_numbers = #tpu.dot_dimension_numbers<[1], [0], [0], [1], [0, 0, 1, 1], [], []>} : vector<8x64xbf16>, vector<64x64xbf16>, vector<8x64xf32> -> vector<8x64xf32>
    %116 = vector.extract_strided_slice %75 {offsets = [4, 0], sizes = [1, 64], strides = [1, 1]} : vector<5x64xf32> to vector<1x64xf32>
    %117 = vector.broadcast %116 : vector<1x64xf32> to vector<8x64xf32>
    %118 = arith.addf %115, %117 : vector<8x64xf32>
    %cst_44 = arith.constant 0.000000e+00 : f32
    %119 = vector.broadcast %cst_44 : f32 to vector<8x64xf32>
    %120 = arith.maximumf %118, %119 : vector<8x64xf32>
    %121 = arith.addf %69, %120 : vector<8x64xf32>
    %c2 = arith.constant 2 : index
    %c0_45 = arith.constant 0 : index
    %c0_46 = arith.constant 0 : index
    %122 = vector.load %arg2[%c2, %c0_45, %c0_46] : memref<4x256x64xbf16, #tpu.memory_space<vmem>>, vector<1x256x64xbf16>
    %123 = vector.shape_cast %122 : vector<1x256x64xbf16> to vector<256x64xbf16>
    %c2_47 = arith.constant 2 : index
    %c0_48 = arith.constant 0 : index
    %c0_49 = arith.constant 0 : index
    %124 = vector.load %arg3[%c2_47, %c0_48, %c0_49] : memref<4x128x64xbf16, #tpu.memory_space<vmem>>, vector<1x128x64xbf16>
    %125 = vector.shape_cast %124 : vector<1x128x64xbf16> to vector<128x64xbf16>
    %c2_50 = arith.constant 2 : index
    %c0_51 = arith.constant 0 : index
    %c0_52 = arith.constant 0 : index
    %126 = vector.load %arg4[%c2_50, %c0_51, %c0_52] : memref<4x5x64xf32, #tpu.memory_space<vmem>>, vector<1x5x64xf32>
    %127 = vector.shape_cast %126 : vector<1x5x64xf32> to vector<5x64xf32>
    %128 = arith.truncf %121 : vector<8x64xf32> to vector<8x64xbf16>
    %cst_53 = arith.constant dense<0.000000e+00> : vector<32x64xf32>
    %129 = tpu.matmul %16, %128, %cst_53 {dimension_numbers = #tpu.dot_dimension_numbers<[1], [0], [0], [1], [0, 0, 1, 1], [], []>} : vector<32x8xbf16>, vector<8x64xbf16>, vector<32x64xf32> -> vector<32x64xf32>
    %130 = vector.extract_strided_slice %129 {offsets = [0, 0], sizes = [16, 64], strides = [1, 1]} : vector<32x64xf32> to vector<16x64xf32>
    %131 = vector.extract_strided_slice %129 {offsets = [16, 0], sizes = [16, 64], strides = [1, 1]} : vector<32x64xf32> to vector<16x64xf32>
    %132 = tpu.concatenate %130, %131 in 1 : vector<16x64xf32>, vector<16x64xf32> -> vector<16x128xf32>
    %133 = arith.truncf %132 : vector<16x128xf32> to vector<16x128xbf16>
    %134 = vector.extract_strided_slice %123 {offsets = [0, 0], sizes = [128, 64], strides = [1, 1]} : vector<256x64xbf16> to vector<128x64xbf16>
    %cst_54 = arith.constant dense<0.000000e+00> : vector<16x64xf32>
    %135 = tpu.matmul %133, %134, %cst_54 {dimension_numbers = #tpu.dot_dimension_numbers<[1], [0], [0], [1], [0, 0, 1, 1], [], []>} : vector<16x128xbf16>, vector<128x64xbf16>, vector<16x64xf32> -> vector<16x64xf32>
    %136 = vector.extract_strided_slice %127 {offsets = [0, 0], sizes = [1, 64], strides = [1, 1]} : vector<5x64xf32> to vector<1x64xf32>
    %137 = vector.broadcast %9 : vector<16x1xf32> to vector<16x64xf32>
    %138 = vector.broadcast %136 : vector<1x64xf32> to vector<16x64xf32>
    %139 = arith.mulf %137, %138 : vector<16x64xf32>
    %140 = arith.addf %135, %139 : vector<16x64xf32>
    %141 = vector.extract_strided_slice %127 {offsets = [1, 0], sizes = [1, 64], strides = [1, 1]} : vector<5x64xf32> to vector<1x64xf32>
    %142 = vector.broadcast %141 : vector<1x64xf32> to vector<16x64xf32>
    %143 = arith.addf %140, %142 : vector<16x64xf32>
    %cst_55 = arith.constant 0.000000e+00 : f32
    %144 = vector.broadcast %cst_55 : f32 to vector<16x64xf32>
    %145 = arith.maximumf %143, %144 : vector<16x64xf32>
    %146 = arith.truncf %145 : vector<16x64xf32> to vector<16x64xbf16>
    %147 = vector.extract_strided_slice %125 {offsets = [0, 0], sizes = [64, 64], strides = [1, 1]} : vector<128x64xbf16> to vector<64x64xbf16>
    %cst_56 = arith.constant dense<0.000000e+00> : vector<16x64xf32>
    %148 = tpu.matmul %146, %147, %cst_56 {dimension_numbers = #tpu.dot_dimension_numbers<[1], [0], [0], [1], [0, 0, 1, 1], [], []>} : vector<16x64xbf16>, vector<64x64xbf16>, vector<16x64xf32> -> vector<16x64xf32>
    %149 = vector.extract_strided_slice %127 {offsets = [2, 0], sizes = [1, 64], strides = [1, 1]} : vector<5x64xf32> to vector<1x64xf32>
    %150 = vector.broadcast %149 : vector<1x64xf32> to vector<16x64xf32>
    %151 = arith.addf %148, %150 : vector<16x64xf32>
    %cst_57 = arith.constant 0.000000e+00 : f32
    %152 = vector.broadcast %cst_57 : f32 to vector<16x64xf32>
    %153 = arith.maximumf %151, %152 : vector<16x64xf32>
    %154 = arith.truncf %153 : vector<16x64xf32> to vector<16x64xbf16>
    %cst_58 = arith.constant dense<0.000000e+00> : vector<8x64xf32>
    %155 = tpu.matmul %17, %154, %cst_58 {dimension_numbers = #tpu.dot_dimension_numbers<[0], [0], [1], [1], [0, 1, 1, 1], [], []>} : vector<16x8xbf16>, vector<16x64xbf16>, vector<8x64xf32> -> vector<8x64xf32>
    %156 = tpu.concatenate %121, %155 in 1 : vector<8x64xf32>, vector<8x64xf32> -> vector<8x128xf32>
    %157 = arith.truncf %156 : vector<8x128xf32> to vector<8x128xbf16>
    %158 = vector.extract_strided_slice %123 {offsets = [128, 0], sizes = [128, 64], strides = [1, 1]} : vector<256x64xbf16> to vector<128x64xbf16>
    %cst_59 = arith.constant dense<0.000000e+00> : vector<8x64xf32>
    %159 = tpu.matmul %157, %158, %cst_59 {dimension_numbers = #tpu.dot_dimension_numbers<[1], [0], [0], [1], [0, 0, 1, 1], [], []>} : vector<8x128xbf16>, vector<128x64xbf16>, vector<8x64xf32> -> vector<8x64xf32>
    %160 = vector.extract_strided_slice %127 {offsets = [3, 0], sizes = [1, 64], strides = [1, 1]} : vector<5x64xf32> to vector<1x64xf32>
    %161 = vector.broadcast %160 : vector<1x64xf32> to vector<8x64xf32>
    %162 = arith.addf %159, %161 : vector<8x64xf32>
    %cst_60 = arith.constant 0.000000e+00 : f32
    %163 = vector.broadcast %cst_60 : f32 to vector<8x64xf32>
    %164 = arith.maximumf %162, %163 : vector<8x64xf32>
    %165 = arith.truncf %164 : vector<8x64xf32> to vector<8x64xbf16>
    %166 = vector.extract_strided_slice %125 {offsets = [64, 0], sizes = [64, 64], strides = [1, 1]} : vector<128x64xbf16> to vector<64x64xbf16>
    %cst_61 = arith.constant dense<0.000000e+00> : vector<8x64xf32>
    %167 = tpu.matmul %165, %166, %cst_61 {dimension_numbers = #tpu.dot_dimension_numbers<[1], [0], [0], [1], [0, 0, 1, 1], [], []>} : vector<8x64xbf16>, vector<64x64xbf16>, vector<8x64xf32> -> vector<8x64xf32>
    %168 = vector.extract_strided_slice %127 {offsets = [4, 0], sizes = [1, 64], strides = [1, 1]} : vector<5x64xf32> to vector<1x64xf32>
    %169 = vector.broadcast %168 : vector<1x64xf32> to vector<8x64xf32>
    %170 = arith.addf %167, %169 : vector<8x64xf32>
    %cst_62 = arith.constant 0.000000e+00 : f32
    %171 = vector.broadcast %cst_62 : f32 to vector<8x64xf32>
    %172 = arith.maximumf %170, %171 : vector<8x64xf32>
    %173 = arith.addf %121, %172 : vector<8x64xf32>
    %c3 = arith.constant 3 : index
    %c0_63 = arith.constant 0 : index
    %c0_64 = arith.constant 0 : index
    %174 = vector.load %arg2[%c3, %c0_63, %c0_64] : memref<4x256x64xbf16, #tpu.memory_space<vmem>>, vector<1x256x64xbf16>
    %175 = vector.shape_cast %174 : vector<1x256x64xbf16> to vector<256x64xbf16>
    %c3_65 = arith.constant 3 : index
    %c0_66 = arith.constant 0 : index
    %c0_67 = arith.constant 0 : index
    %176 = vector.load %arg3[%c3_65, %c0_66, %c0_67] : memref<4x128x64xbf16, #tpu.memory_space<vmem>>, vector<1x128x64xbf16>
    %177 = vector.shape_cast %176 : vector<1x128x64xbf16> to vector<128x64xbf16>
    %c3_68 = arith.constant 3 : index
    %c0_69 = arith.constant 0 : index
    %c0_70 = arith.constant 0 : index
    %178 = vector.load %arg4[%c3_68, %c0_69, %c0_70] : memref<4x5x64xf32, #tpu.memory_space<vmem>>, vector<1x5x64xf32>
    %179 = vector.shape_cast %178 : vector<1x5x64xf32> to vector<5x64xf32>
    %180 = arith.truncf %173 : vector<8x64xf32> to vector<8x64xbf16>
    %cst_71 = arith.constant dense<0.000000e+00> : vector<32x64xf32>
    %181 = tpu.matmul %16, %180, %cst_71 {dimension_numbers = #tpu.dot_dimension_numbers<[1], [0], [0], [1], [0, 0, 1, 1], [], []>} : vector<32x8xbf16>, vector<8x64xbf16>, vector<32x64xf32> -> vector<32x64xf32>
    %182 = vector.extract_strided_slice %181 {offsets = [0, 0], sizes = [16, 64], strides = [1, 1]} : vector<32x64xf32> to vector<16x64xf32>
    %183 = vector.extract_strided_slice %181 {offsets = [16, 0], sizes = [16, 64], strides = [1, 1]} : vector<32x64xf32> to vector<16x64xf32>
    %184 = tpu.concatenate %182, %183 in 1 : vector<16x64xf32>, vector<16x64xf32> -> vector<16x128xf32>
    %185 = arith.truncf %184 : vector<16x128xf32> to vector<16x128xbf16>
    %186 = vector.extract_strided_slice %175 {offsets = [0, 0], sizes = [128, 64], strides = [1, 1]} : vector<256x64xbf16> to vector<128x64xbf16>
    %cst_72 = arith.constant dense<0.000000e+00> : vector<16x64xf32>
    %187 = tpu.matmul %185, %186, %cst_72 {dimension_numbers = #tpu.dot_dimension_numbers<[1], [0], [0], [1], [0, 0, 1, 1], [], []>} : vector<16x128xbf16>, vector<128x64xbf16>, vector<16x64xf32> -> vector<16x64xf32>
    %188 = vector.extract_strided_slice %179 {offsets = [0, 0], sizes = [1, 64], strides = [1, 1]} : vector<5x64xf32> to vector<1x64xf32>
    %189 = vector.broadcast %9 : vector<16x1xf32> to vector<16x64xf32>
    %190 = vector.broadcast %188 : vector<1x64xf32> to vector<16x64xf32>
    %191 = arith.mulf %189, %190 : vector<16x64xf32>
    %192 = arith.addf %187, %191 : vector<16x64xf32>
    %193 = vector.extract_strided_slice %179 {offsets = [1, 0], sizes = [1, 64], strides = [1, 1]} : vector<5x64xf32> to vector<1x64xf32>
    %194 = vector.broadcast %193 : vector<1x64xf32> to vector<16x64xf32>
    %195 = arith.addf %192, %194 : vector<16x64xf32>
    %cst_73 = arith.constant 0.000000e+00 : f32
    %196 = vector.broadcast %cst_73 : f32 to vector<16x64xf32>
    %197 = arith.maximumf %195, %196 : vector<16x64xf32>
    %198 = arith.truncf %197 : vector<16x64xf32> to vector<16x64xbf16>
    %199 = vector.extract_strided_slice %177 {offsets = [0, 0], sizes = [64, 64], strides = [1, 1]} : vector<128x64xbf16> to vector<64x64xbf16>
    %cst_74 = arith.constant dense<0.000000e+00> : vector<16x64xf32>
    %200 = tpu.matmul %198, %199, %cst_74 {dimension_numbers = #tpu.dot_dimension_numbers<[1], [0], [0], [1], [0, 0, 1, 1], [], []>} : vector<16x64xbf16>, vector<64x64xbf16>, vector<16x64xf32> -> vector<16x64xf32>
    %201 = vector.extract_strided_slice %179 {offsets = [2, 0], sizes = [1, 64], strides = [1, 1]} : vector<5x64xf32> to vector<1x64xf32>
    %202 = vector.broadcast %201 : vector<1x64xf32> to vector<16x64xf32>
    %203 = arith.addf %200, %202 : vector<16x64xf32>
    %cst_75 = arith.constant 0.000000e+00 : f32
    %204 = vector.broadcast %cst_75 : f32 to vector<16x64xf32>
    %205 = arith.maximumf %203, %204 : vector<16x64xf32>
    %206 = arith.truncf %205 : vector<16x64xf32> to vector<16x64xbf16>
    %cst_76 = arith.constant dense<0.000000e+00> : vector<8x64xf32>
    %207 = tpu.matmul %17, %206, %cst_76 {dimension_numbers = #tpu.dot_dimension_numbers<[0], [0], [1], [1], [0, 1, 1, 1], [], []>} : vector<16x8xbf16>, vector<16x64xbf16>, vector<8x64xf32> -> vector<8x64xf32>
    %208 = tpu.concatenate %173, %207 in 1 : vector<8x64xf32>, vector<8x64xf32> -> vector<8x128xf32>
    %209 = arith.truncf %208 : vector<8x128xf32> to vector<8x128xbf16>
    %210 = vector.extract_strided_slice %175 {offsets = [128, 0], sizes = [128, 64], strides = [1, 1]} : vector<256x64xbf16> to vector<128x64xbf16>
    %cst_77 = arith.constant dense<0.000000e+00> : vector<8x64xf32>
    %211 = tpu.matmul %209, %210, %cst_77 {dimension_numbers = #tpu.dot_dimension_numbers<[1], [0], [0], [1], [0, 0, 1, 1], [], []>} : vector<8x128xbf16>, vector<128x64xbf16>, vector<8x64xf32> -> vector<8x64xf32>
    %212 = vector.extract_strided_slice %179 {offsets = [3, 0], sizes = [1, 64], strides = [1, 1]} : vector<5x64xf32> to vector<1x64xf32>
    %213 = vector.broadcast %212 : vector<1x64xf32> to vector<8x64xf32>
    %214 = arith.addf %211, %213 : vector<8x64xf32>
    %cst_78 = arith.constant 0.000000e+00 : f32
    %215 = vector.broadcast %cst_78 : f32 to vector<8x64xf32>
    %216 = arith.maximumf %214, %215 : vector<8x64xf32>
    %217 = arith.truncf %216 : vector<8x64xf32> to vector<8x64xbf16>
    %218 = vector.extract_strided_slice %177 {offsets = [64, 0], sizes = [64, 64], strides = [1, 1]} : vector<128x64xbf16> to vector<64x64xbf16>
    %cst_79 = arith.constant dense<0.000000e+00> : vector<8x64xf32>
    %219 = tpu.matmul %217, %218, %cst_79 {dimension_numbers = #tpu.dot_dimension_numbers<[1], [0], [0], [1], [0, 0, 1, 1], [], []>} : vector<8x64xbf16>, vector<64x64xbf16>, vector<8x64xf32> -> vector<8x64xf32>
    %220 = vector.extract_strided_slice %179 {offsets = [4, 0], sizes = [1, 64], strides = [1, 1]} : vector<5x64xf32> to vector<1x64xf32>
    %221 = vector.broadcast %220 : vector<1x64xf32> to vector<8x64xf32>
    %222 = arith.addf %219, %221 : vector<8x64xf32>
    %cst_80 = arith.constant 0.000000e+00 : f32
    %223 = vector.broadcast %cst_80 : f32 to vector<8x64xf32>
    %224 = arith.maximumf %222, %223 : vector<8x64xf32>
    %225 = arith.addf %173, %224 : vector<8x64xf32>
    %cst_81 = arith.constant dense<0.000000e+00> : vector<64xf32>
    %226 = vector.multi_reduction <add>, %225, %cst_81 [0] : vector<8x64xf32> to vector<64xf32>
    %227 = vector.shape_cast %226 : vector<64xf32> to vector<1x64xf32>
    %cst_82 = arith.constant 1.250000e-01 : f32
    %228 = vector.broadcast %cst_82 : f32 to vector<1x64xf32>
    %229 = arith.mulf %227, %228 : vector<1x64xf32>
    %c16 = arith.constant 16 : index
    %c0_83 = arith.constant 0 : index
    %230 = vector.load %arg5[%c16, %c0_83] : memref<32x64xf32, #tpu.memory_space<vmem>>, vector<1x64xf32>
    %c24 = arith.constant 24 : index
    %c0_84 = arith.constant 0 : index
    %231 = vector.load %arg5[%c24, %c0_84] : memref<32x64xf32, #tpu.memory_space<vmem>>, vector<1x1xf32>
    %232 = arith.mulf %229, %230 : vector<1x64xf32>
    %cst_85 = arith.constant dense<0.000000e+00> : vector<1xf32>
    %233 = vector.multi_reduction <add>, %232, %cst_85 [1] : vector<1x64xf32> to vector<1xf32>
    %234 = vector.shape_cast %233 : vector<1xf32> to vector<1x1xf32>
    %235 = arith.addf %234, %231 : vector<1x1xf32>
    %c0_86 = arith.constant 0 : index
    %c0_87 = arith.constant 0 : index
    %236 = vector.load %arg6[%c0_86, %c0_87] : memref<1x1xf32, #tpu.memory_space<vmem>>, vector<1x1xf32>
    tpu.vector_store %arg6[%c0_86, %c0_87], %235 {strides = array<i32>} : memref<1x1xf32, #tpu.memory_space<vmem>>, vector<1x1xf32>,
    return
  }
}

</mosaic_0001>

<bundles_post_ra>
// kernel: tpu_custom_call.1
= control target key start
LH: loop header
LB: loop body
LE: loop exit
PB: predicated region body
PF: predicated region fallthrough
CT: control target
= control target key end

     0   :  { %vm32_vm0 = vcmask 64512   ;;  %v3104_v2 = vmov 0.0   ;;  %vm3105_vm1 = vmmov 0   ;;  %v3106_v6 = vmov 0   ;;  %s3799_s0 = inlined_call_operand.vmem [shape: f32[8,8], index: 0, kind: input, shape index: {}]   ;;  %s3800_s1 = inlined_call_operand.vmem [shape: f32[48,1], index: 1, kind: input, shape index: {}]   ;;  %s3801_s2 = inlined_call_operand.vmem [shape: bf16[4,256,64], index: 2, kind: input, shape index: {}]   ;;  %s3802_s3 = inlined_call_operand.vmem [shape: bf16[4,128,64], index: 3, kind: input, shape index: {}]   ;;  %s3803_s4 = inlined_call_operand.vmem [shape: f32[4,5,64], index: 4, kind: input, shape index: {}]   ;;  %s3804_s5 = inlined_call_operand.vmem [shape: f32[32,64], index: 5, kind: input, shape index: {}]   ;;  %s3805_s6 = inlined_call_operand.hbm [shape: f32[1,1], index: 6, kind: output, shape index: {}]  }
   0x1   :  { %v26_v0 = vld [vmem:[%s3804_s5] sm:$0xff]  ;;  %2638 = vmatprep.subr.mxu0 %v3104_v2  ;;  %2640 = vmatprep.mubr.msk.f32.mxu0 %vm3105_vm1, %v3104_v2  ;;  %v108_v3 = vld [vmem:[%s3800_s1 + $0x10] sm:$0xff]  ;;  %v109_v5 = vld [vmem:[%s3800_s1 + $0x18] sm:$0xff] }
   0x2   :  { %v25_v1 = vld [vmem:[%s3799_s0] sm:$0xff]  ;;  %2639 = vmatpush3.msra.mxu0 %v26_v0  ;;  %2965 = vset.pattern.permute.xlu1 %v3106_v6  ;;  %v2955_v7 = vtrunc.f32 %v108_v3  ;;  %v2957_v9 = vtrunc.f32 %v109_v5  ;;  %v107_v10 = vld [vmem:[%s3800_s1 + $0x8] sm:$0xff] }
   0x3   :  { %v106_v4 = vld [vmem:[%s3800_s1] sm:$0xff]  ;;  %2641 = vmatmul.mubr.msk.f32.vlgmr.msra.gmra.mxu0 %vm32_vm0, %v25_v1  ;;  %2964 = vset.pattern.permute.xlu0 %v3106_v6  ;;  %v2953_v11 = vtrunc.f32 %v107_v10 }
   0x4   :  { %v2951_v8 = vtrunc.f32 %v106_v4  ;;  %v2956_v12 = vcvt.f32.s32 %v2955_v7  ;;  %2669 = vmatprep.subr.bf16.mxu1 %v3104_v2  ;;  %2677 = vmatprep.mubr.msk.bf16.mxu1 %vm3105_vm1, %v3104_v2  ;;  %v2958_v14 = vcvt.f32.s32 %v2957_v9  ;;  %v110_v16 = vld [vmem:[%s3800_s1 + $0x20] sm:$0xff] }
   0x5   :  { %v2954_v15 = vcvt.f32.s32 %v2953_v11 }
   0x6   :  { %v2952_v13 = vcvt.f32.s32 %v2951_v8  ;;  %125 = vperm.xlu1 %2965, %v2956_v12  }
   0x8   :  { %119 = vperm.xlu0 %2964, %v2952_v13  }
   0xa   :  { %128 = vperm.xlu1 %2965, %v2958_v14  }
   0xc   :  { %122 = vperm.xlu0 %2964, %v2954_v15  }
   0xe   :  { %263 = vperm.xlu1 %2965, %v110_v16  }
   0xf   :  { %11 = vsyncpa [#allocation3], 0  ;;  %v116_v17 = vlaneseq  ;;  %v2239_v25 = vld [vmem:[%s3804_s5 + $0x8] ss:$0 sm:$0xff]  ;;  %vm196_vm6 = vcmask 1043456   ;;  %v2986_v35 = vld [vmem:[%s3801_s2 + $0x38] sm:$0xff]  }
  0x10   :  { %v2987_v36 = vld [vmem:[%s3801_s2 + $0x30] sm:$0xff]   ;;  %v2988_v37 = vld [vmem:[%s3801_s2 + $0x28] sm:$0xff]   ;;  %v2989_v38 = vld [vmem:[%s3801_s2 + $0x20] sm:$0xff]   ;;  %s3107_s30 = smov 64   ;;  %vm257_vm7 = vcmask 523264   ;;  %vm466_vm8 = vcmask 130048  }
  0x11   :  { %v117_v18 = vand.u32 127, %v116_v17  ;;  %v2990_v39 = vld [vmem:[%s3801_s2 + $0x18] sm:$0xff]   ;;  %v2991_v40 = vld [vmem:[%s3801_s2 + $0x10] sm:$0xff]   ;;  %v2992_v41 = vld [vmem:[%s3801_s2 + $0x8] sm:$0xff]   ;;  %v3255_v59 = vshrl.u32 %v116_v17, 7  ;;  %vm2218_vm9 = vcmask 516096  }
  0x12   :  { %v2993_v42 = vld [vmem:[%s3801_s2] sm:$0xff]   ;;  %v2994_v47 = vld [vmem:[%s3802_s3 + $0x18] sm:$0xff]   ;;  %v111_v48 = vld [vmem:[%s3800_s1 + $0x28] sm:$0xff]  ;;  %s3108_s14 = smov [#allocation2]   ;;  %vm2223_vm10 = vcmask 0  }
  0x13   :  { %2670 = vmatpush3.bf16.msra.mxu1 %v2994_v47  ;;  %v2995_v56 = vld [vmem:[%s3802_s3 + $0x10] sm:$0xff]   ;;  %v2996_v57 = vld [vmem:[%s3802_s3 + $0x8] sm:$0xff]   ;;  %v2997_v58 = vld [vmem:[%s3802_s3] sm:$0xff]   ;;  %v3258_v60 = vsub.s32 0, %v3255_v59  ;;  %v3270_v0 = vsub.s32 1, %v3255_v59  ;;  %v3282_v17 = vsub.s32 2, %v3255_v59 }
  0x14   :  { %2671 = vmatprep.subr.bf16.mxu1 %v3104_v2  ;;  %v3263_v61 = vld [vmem:[%s3803_s4] sm:$0x1f] }
  0x15   :  { %v274_v62 = vrot.slane %v3263_v61, %v3258_v60  ;;  %v369_v6 = vrot.slane %v3263_v61, %v3270_v0 }
  0x17   :  { %2672 = vmatpush3.bf16.msra.mxu1 %v2995_v56 }
  0x18   :  { %2673 = vmatprep.subr.bf16.mxu1 %v3104_v2 }
  0x1b   :  { %2674 = vmatpush3.bf16.msra.mxu1 %v2996_v57 }
  0x1c   :  { %2675 = vmatprep.subr.bf16.mxu1 %v3104_v2 }
  0x1f   :  { %2676 = vmatpush3.bf16.msra.mxu1 %v2997_v58 }
  0x20   :  { %2681 = vmatprep.subr.bf16.mxu1 %v3104_v2 }
  0x81   :  { %v126_v24 = vpop.permute.xlu1 %125 }
  0x82   :  { %vm132_vm4 = vcmp.eq.s32.totalorder %v126_v24, %v117_v18 }
  0x83   :  { %v120_v19 = vpop.permute.xlu0 %119  ;;  %v136_v31 = vsel %vm132_vm4, 1.0, %v3104_v2 }
  0x84   :  { %vm130_vm2 = vcmp.eq.s32.totalorder %v120_v19, %v117_v18 }
  0x85   :  { %v134_v20 = vsel %vm130_vm2, 1.0, %v3104_v2  ;;  %v129_v26 = vpop.permute.xlu1 %128 }
  0x86   :  { %vm133_vm5 = vcmp.eq.s32.totalorder %v129_v26, %v117_v18 }
  0x87   :  { %v123_v21 = vpop.permute.xlu0 %122  ;;  %v137_v32 = vsel %vm133_vm5, 1.0, %v3104_v2 }
  0x88   :  { %vm131_vm3 = vcmp.eq.s32.totalorder %v123_v21, %v117_v18  ;;  %v3191_v34 = vpack.c.bf16 %v137_v32, %v136_v31  ;;  %v378_v18 = vrot.slane %v3263_v61, %v3282_v17  ;;  %v2998_v31 = vld [vmem:[%s3801_s2 + $0x78] sm:$0xff]   ;;  %v2999_v32 = vld [vmem:[%s3801_s2 + $0x70] sm:$0xff]  }
  0x89   :  { %v135_v22 = vsel %vm131_vm3, 1.0, %v3104_v2  ;;  %v3267_v63 = vpop.permute.xlu1 %263 }
  0x8a   :  { %v3175_v23 = vpack.c.bf16 %v135_v22, %v134_v20  ;;  %v275_v1 = vmul.f32 %v274_v62, %v3267_v63 }
  0x8c   :  { %450 = vxpose.xlu1.c.b16.start.end [1/1] (short) (narrow) %v3175_v23, 16  ;;  %2645 = vmatprep.mubr.msk.bf16.mxu0 %vm32_vm0, %v3175_v23 }
  0xc3   :  { %v102_v27 = vpop.f32.mrf.mxu0 }
  0xc4   :  { %v3183_v28 = vadd.f32 %v2239_v25, %v102_v27 }
  0xc5   :  { %v2642_v29 = vpop.f32.mrf.mxu0 }
  0xc6   :  { %v189_v30 = vpack.c.bf16 %v3183_v28, %v3183_v28 }
  0xc8   :  { %2947 = vmatprep.subr.msk.bf16.mxu0 %vm196_vm6, %v189_v30  ;;  %v198_v33 = vsel %vm196_vm6, %v189_v30, 0 }
  0xc9   :  { %2644 = vmatpush3.bf16.msra.mxu0 %v198_v33  ;;  %v3000_v33 = vld [vmem:[%s3801_s2 + $0x68] sm:$0xff]  }
  0xca   :  { %2649 = vmatprep.subr.bf16.mxu0 %v3104_v2 }
  0xcc   :  { %2646 = vmatmul.mubr.msk.bf16.vlgmr.msra.gmra.mxu0 %vm32_vm0, %v3191_v34 }
  0xcd   :  { %2665 = vmatprep.mubr.msk.bf16.mxu0 %vm3105_vm1, %v3104_v2  ;;  %2650 = vmatpush3.bf16.msra.mxu0 %v2986_v35  ;;  %v3001_v35 = vld [vmem:[%s3801_s2 + $0x60] sm:$0xff]  }
  0xce   :  { %2651 = vmatprep.subr.bf16.mxu0 %v3104_v2 }
  0xd1   :  { %2652 = vmatpush3.bf16.msra.mxu0 %v2987_v36  ;;  %v3002_v36 = vld [vmem:[%s3801_s2 + $0x58] sm:$0xff]  }
  0xd2   :  { %2653 = vmatprep.subr.bf16.mxu0 %v3104_v2 }
  0xd5   :  { %2654 = vmatpush3.bf16.msra.mxu0 %v2988_v37  ;;  %v3003_v37 = vld [vmem:[%s3801_s2 + $0x50] sm:$0xff]  }
  0xd6   :  { %2655 = vmatprep.subr.bf16.mxu0 %v3104_v2 }
  0xd9   :  { %2656 = vmatpush3.bf16.msra.mxu0 %v2989_v38  ;;  %v3004_v38 = vld [vmem:[%s3801_s2 + $0x48] sm:$0xff]  }
  0xda   :  { %2657 = vmatprep.subr.bf16.mxu0 %v3104_v2 }
  0xdd   :  { %2658 = vmatpush3.bf16.msra.mxu0 %v2990_v39  ;;  %v3005_v39 = vld [vmem:[%s3801_s2 + $0x40] sm:$0xff]  }
  0xde   :  { %2659 = vmatprep.subr.bf16.mxu0 %v3104_v2 }
  0xe1   :  { %2660 = vmatpush3.bf16.msra.mxu0 %v2991_v40  ;;  %v3006_v40 = vld [vmem:[%s3802_s3 + $0x38] sm:$0xff]  }
  0xe2   :  { %2661 = vmatprep.subr.bf16.mxu0 %v3104_v2 }
  0xe5   :  { %2662 = vmatpush3.bf16.msra.mxu0 %v2992_v41  ;;  %v3007_v41 = vld [vmem:[%s3802_s3 + $0x30] sm:$0xff]  }
  0xe6   :  { %2663 = vmatprep.subr.bf16.mxu0 %v3104_v2 }
  0xe9   :  { %2664 = vmatpush3.bf16.msra.mxu0 %v2993_v42 }
  0xea   :  { %2707 = vmatprep.subr.bf16.mxu0 %v3104_v2 }
  0xee   :  { %v3286_v30 = vpop.trf.xlu1 }
 0x18c   :  { %v2647_v43 = vpop.f32.mrf.mxu0 }
 0x18e   :  { %v234_v44 = vpop.f32.mrf.mxu0 }
 0x190   :  { %v2648_v45 = vpop.f32.mrf.mxu0 }
 0x191   :  { %v2966_v46 = vpack.i.bf16 %v2648_v45, %v2647_v43 }
 0x192   :  { %v237_v52 = vpop.f32.mrf.mxu0 }
 0x193   :  { %2967 = vrot.lane.b32.xlu0 %v2966_v46, %s3107_s30 }
 0x197   :  { %268 = vperm.xlu0 %2964, %v111_v48  }
 0x205   :  { %v2968_v49 = vpop.permute.xlu0 %2967 }
 0x206   :  { %v2970_v50 = vunpack.i.h.bf16 %v2968_v49  ;;  %v2969_v51 = vunpack.i.l.bf16 %v2968_v49  ;;  %v3008_v49 = vld [vmem:[%s3802_s3 + $0x28] sm:$0xff]  }
 0x208   :  { %v258_v53 = vsel %vm257_vm7, %v234_v44, %v2969_v51  ;;  %v259_v54 = vsel %vm257_vm7, %v237_v52, %v2970_v50  ;;  %v3009_v50 = vld [vmem:[%s3802_s3 + $0x20] sm:$0xff]   ;;  %v3346_v51 = vsub.s32 3, %v3255_v59 }
 0x209   :  { %v260_v55 = vpack.c.bf16 %v259_v54, %v258_v53 }
 0x20a   :  { %v519_v52 = vrot.slane %v3263_v61, %v3346_v51 }
 0x20b   :  { %2666 = vmatmul.mubr.bf16.vlgmr.msra.gmra.mxu0 %v260_v55 }
 0x20c   :  { %2715 = vmatprep.mubr.msk.bf16.mxu0 %vm3105_vm1, %v3104_v2  ;;  %2708 = vmatpush3.bf16.msra.mxu0 %v3006_v40 }
 0x20d   :  { %2709 = vmatprep.subr.bf16.mxu0 %v3104_v2 }
 0x210   :  { %2710 = vmatpush3.bf16.msra.mxu0 %v3007_v41 }
 0x211   :  { %2711 = vmatprep.subr.bf16.mxu0 %v3104_v2 }
 0x212   :  { %v3273_v3 = vpop.permute.xlu0 %268 }
 0x213   :  { %v276_v8 = vmul.f32 %v274_v62, %v3273_v3 }
 0x214   :  { %2712 = vmatpush3.bf16.msra.mxu0 %v3008_v49 }
 0x215   :  { %2713 = vmatprep.subr.bf16.mxu0 %v3104_v2 }
 0x218   :  { %2714 = vmatpush3.bf16.msra.mxu0 %v3009_v50 }
 0x2cb   :  { %v359_v4 = vpop.f32.mrf.mxu0 }
 0x2cc   :  { %v360_v5 = vadd.f32 %v359_v4, %v275_v1  ;;  %v3354_v1 = vsub.s32 4, %v3255_v59 }
 0x2cd   :  { %v2667_v7 = vpop.f32.mrf.mxu0 }
 0x2ce   :  { %v370_v10 = vadd.f32 %v369_v6, %v360_v5  ;;  %v613_v4 = vrot.slane %v3263_v61, %v3354_v1  ;;  %v3011_v61 = vld [vmem:[%s3801_s2 + $0xb0] sm:$0xff]  }
 0x2cf   :  { %v362_v9 = vpop.f32.mrf.mxu0 }
 0x2d0   :  { %v363_v11 = vadd.f32 %v362_v9, %v276_v8  ;;  %v372_v14 = vmax.f32 %v370_v10, 0.0 }
 0x2d1   :  { %v2668_v12 = vpop.f32.mrf.mxu0 }
 0x2d2   :  { %v371_v13 = vadd.f32 %v369_v6, %v363_v11 }
 0x2d4   :  { %v373_v15 = vmax.f32 %v371_v13, 0.0  ;;  %v3012_v13 = vld [vmem:[%s3801_s2 + $0xa8] sm:$0xff]  }
 0x2d6   :  { %v374_v16 = vpack.c.bf16 %v373_v15, %v372_v14  ;;  %v3013_v14 = vld [vmem:[%s3801_s2 + $0xa0] sm:$0xff]   ;;  %v3014_v15 = vld [vmem:[%s3801_s2 + $0x98] sm:$0xff]  }
 0x2d8   :  { %2678 = vmatmul.mubr.msk.bf16.vlgmr.msra.gmra.mxu1 %vm257_vm7, %v374_v16  ;;  %v3015_v16 = vld [vmem:[%s3801_s2 + $0x90] sm:$0xff]  }
 0x2d9   :  { %2683 = vmatprep.mubr.msk.bf16.mxu1 %vm3105_vm1, %v3104_v2 }
 0x398   :  { %v440_v19 = vpop.f32.mrf.mxu1 }
 0x399   :  { %v441_v21 = vadd.f32 %v440_v19, %v378_v18  ;;  %v3017_v19 = vld [vmem:[%s3801_s2 + $0x80] sm:$0xff]  }
 0x39a   :  { %v2679_v20 = vpop.f32.mrf.mxu1 }
 0x39b   :  { %v447_v26 = vmax.f32 %v441_v21, 0.0  ;;  %v3018_v20 = vld [vmem:[%s3802_s3 + $0x58] sm:$0xff]  }
 0x39c   :  { %v443_v22 = vpop.f32.mrf.mxu1 }
 0x39d   :  { %v444_v24 = vadd.f32 %v443_v22, %v378_v18  ;;  %v3016_v18 = vld [vmem:[%s3801_s2 + $0x88] sm:$0xff]  }
 0x39e   :  { %v2680_v25 = vpop.f32.mrf.mxu1 }
 0x39f   :  { %v448_v27 = vmax.f32 %v444_v24, 0.0 }
 0x3a1   :  { %v449_v29 = vpack.c.bf16 %v448_v27, %v447_v26 }
 0x3a3   :  { %2682 = vmatpush3.bf16.msra.mxu1 %v449_v29 }
 0x3a4   :  { %2687 = vmatprep.subr.bf16.mxu1 %v3104_v2 }
 0x3a6   :  { %2684 = vmatmul.mubr.msk.bf16.vlgmr.msra.gmra.mxu1 %vm466_vm8, %v3286_v30 }
 0x3a7   :  { %2703 = vmatprep.mubr.msk.bf16.mxu1 %vm3105_vm1, %v3104_v2  ;;  %2688 = vmatpush3.bf16.msra.mxu1 %v2998_v31 }
 0x3a8   :  { %2689 = vmatprep.subr.bf16.mxu1 %v3104_v2 }
 0x3ab   :  { %2690 = vmatpush3.bf16.msra.mxu1 %v2999_v32 }
 0x3ac   :  { %2691 = vmatprep.subr.bf16.mxu1 %v3104_v2 }
 0x3af   :  { %2692 = vmatpush3.bf16.msra.mxu1 %v3000_v33 }
 0x3b0   :  { %2693 = vmatprep.subr.bf16.mxu1 %v3104_v2 }
 0x3b3   :  { %2694 = vmatpush3.bf16.msra.mxu1 %v3001_v35 }
 0x3b4   :  { %2695 = vmatprep.subr.bf16.mxu1 %v3104_v2 }
 0x3b7   :  { %2696 = vmatpush3.bf16.msra.mxu1 %v3002_v36  ;;  %v3019_v36 = vld [vmem:[%s3802_s3 + $0x50] sm:$0xff]  }
 0x3b8   :  { %2697 = vmatprep.subr.bf16.mxu1 %v3104_v2 }
 0x3bb   :  { %2698 = vmatpush3.bf16.msra.mxu1 %v3003_v37  ;;  %v3020_v37 = vld [vmem:[%s3802_s3 + $0x48] sm:$0xff]  }
 0x3bc   :  { %2699 = vmatprep.subr.bf16.mxu1 %v3104_v2 }
 0x3bf   :  { %2700 = vmatpush3.bf16.msra.mxu1 %v3004_v38  ;;  %v3021_v38 = vld [vmem:[%s3802_s3 + $0x40] sm:$0xff]  }
 0x3c0   :  { %2701 = vmatprep.subr.bf16.mxu1 %v3104_v2 }
 0x3c3   :  { %2702 = vmatpush3.bf16.msra.mxu1 %v3005_v39  ;;  %v3426_v39 = vld [vmem:[%s3803_s4 + $0x8] sm:$0x1f] }
 0x3c4   :  { %2745 = vmatprep.subr.bf16.mxu1 %v3104_v2  ;;  %v802_v40 = vrot.slane %v3426_v39, %v3258_v60 }
 0x3c6   :  { %v803_v41 = vmul.f32 %v802_v40, %v3267_v63 }
 0x466   :  { %v504_v42 = vpop.f32.mrf.mxu1 }
 0x467   :  { %511 = vrot.lane.b32.xlu0 %v504_v42, %s3107_s30 }
 0x468   :  { %v2685_v43 = vpop.f32.mrf.mxu1 }
 0x46a   :  { %v507_v44 = vpop.f32.mrf.mxu1 }
 0x46b   :  { %v897_v44 = vrot.slane %v3426_v39, %v3270_v0 }
 0x46c   :  { %v2686_v45 = vpop.f32.mrf.mxu1 }
 0x4d9   :  { %v512_v46 = vpop.permute.xlu0 %511 }
 0x4da   :  { %v514_v47 = vsel %vm257_vm7, %v3183_v28, %v512_v46  ;;  %v804_v46 = vmul.f32 %v802_v40, %v3273_v3 }
 0x4db   :  { %v515_v48 = vpack.c.bf16 %v514_v47, %v514_v47 }
 0x4dd   :  { %2704 = vmatmul.mubr.bf16.vlgmr.msra.gmra.mxu1 %v515_v48 }
 0x4de   :  { %2753 = vmatprep.mubr.msk.bf16.mxu1 %vm3105_vm1, %v3104_v2  ;;  %2746 = vmatpush3.bf16.msra.mxu1 %v3018_v20 }
 0x4df   :  { %2747 = vmatprep.subr.bf16.mxu1 %v3104_v2 }
 0x4e2   :  { %2748 = vmatpush3.bf16.msra.mxu1 %v3019_v36 }
 0x4e3   :  { %2749 = vmatprep.subr.bf16.mxu1 %v3104_v2 }
 0x4e6   :  { %2750 = vmatpush3.bf16.msra.mxu1 %v3020_v37 }
 0x4e7   :  { %2751 = vmatprep.subr.bf16.mxu1 %v3104_v2 }
 0x4ea   :  { %2752 = vmatpush3.bf16.msra.mxu1 %v3021_v38 }
 0x4eb   :  { %2757 = vmatprep.subr.bf16.mxu1 %v3104_v2 }
 0x59d   :  { %v602_v53 = vpop.f32.mrf.mxu1 }
 0x59e   :  { %v603_v54 = vadd.f32 %v602_v53, %v519_v52 }
 0x59f   :  { %v2705_v55 = vpop.f32.mrf.mxu1 }
 0x5a0   :  { %v608_v56 = vmax.f32 %v603_v54, 0.0 }
 0x5a1   :  { %v605_v57 = vpop.f32.mrf.mxu1 }
 0x5a2   :  { %v609_v58 = vpack.c.bf16 %v608_v56, %v608_v56  ;;  %v906_v56 = vrot.slane %v3426_v39, %v3282_v17 }
 0x5a3   :  { %v2706_v62 = vpop.f32.mrf.mxu1 }
 0x5a4   :  { %2716 = vmatmul.mubr.msk.bf16.vlgmr.msra.gmra.mxu0 %vm257_vm7, %v609_v58 }
 0x5a5   :  { %2721 = vmatprep.mubr.msk.bf16.mxu0 %vm32_vm0, %v3175_v23 }
 0x664   :  { %v675_v5 = vpop.f32.mrf.mxu0 }
 0x665   :  { %v676_v6 = vadd.f32 %v675_v5, %v613_v4 }
 0x666   :  { %v2717_v7 = vpop.f32.mrf.mxu0 }
 0x667   :  { %v681_v8 = vmax.f32 %v676_v6, 0.0 }
 0x668   :  { %v678_v9 = vpop.f32.mrf.mxu0 }
 0x669   :  { %v3359_v10 = vadd.f32 %v681_v8, %v3183_v28  ;;  %v3010_v28 = vld [vmem:[%s3801_s2 + $0xb8] sm:$0xff]  }
 0x66a   :  { %v2718_v11 = vpop.f32.mrf.mxu0 }
 0x66b   :  { %v735_v12 = vpack.c.bf16 %v3359_v10, %v3359_v10  ;;  %v3022_v11 = vld [vmem:[%s3801_s2 + $0xf8] sm:$0xff]  }
 0x66d   :  { %2948 = vmatprep.subr.msk.bf16.mxu0 %vm196_vm6, %v735_v12  ;;  %v737_v59 = vsel %vm196_vm6, %v735_v12, 0  ;;  %v3023_v12 = vld [vmem:[%s3801_s2 + $0xf0] sm:$0xff]  }
 0x66e   :  { %2720 = vmatpush3.bf16.msra.mxu0 %v737_v59  ;;  %v3024_v59 = vld [vmem:[%s3801_s2 + $0xe8] sm:$0xff]  }
 0x66f   :  { %2725 = vmatprep.subr.bf16.mxu0 %v3104_v2 }
 0x671   :  { %2722 = vmatmul.mubr.msk.bf16.vlgmr.msra.gmra.mxu0 %vm32_vm0, %v3191_v34 }
 0x672   :  { %2741 = vmatprep.mubr.msk.bf16.mxu0 %vm3105_vm1, %v3104_v2  ;;  %2726 = vmatpush3.bf16.msra.mxu0 %v3010_v28  ;;  %v3025_v28 = vld [vmem:[%s3801_s2 + $0xe0] sm:$0xff]  }
 0x673   :  { %2727 = vmatprep.subr.bf16.mxu0 %v3104_v2 }
 0x676   :  { %2728 = vmatpush3.bf16.msra.mxu0 %v3011_v61  ;;  %v3026_v61 = vld [vmem:[%s3801_s2 + $0xd8] sm:$0xff]  }
 0x677   :  { %2729 = vmatprep.subr.bf16.mxu0 %v3104_v2 }
 0x67a   :  { %2730 = vmatpush3.bf16.msra.mxu0 %v3012_v13  ;;  %v3027_v13 = vld [vmem:[%s3801_s2 + $0xd0] sm:$0xff]  }
 0x67b   :  { %2731 = vmatprep.subr.bf16.mxu0 %v3104_v2 }
 0x67e   :  { %2732 = vmatpush3.bf16.msra.mxu0 %v3013_v14  ;;  %v3028_v14 = vld [vmem:[%s3801_s2 + $0xc8] sm:$0xff]  }
 0x67f   :  { %2733 = vmatprep.subr.bf16.mxu0 %v3104_v2 }
 0x682   :  { %2734 = vmatpush3.bf16.msra.mxu0 %v3014_v15  ;;  %v3029_v15 = vld [vmem:[%s3801_s2 + $0xc0] sm:$0xff]  }
 0x683   :  { %2735 = vmatprep.subr.bf16.mxu0 %v3104_v2 }
 0x686   :  { %2736 = vmatpush3.bf16.msra.mxu0 %v3015_v16  ;;  %v3030_v16 = vld [vmem:[%s3802_s3 + $0x78] sm:$0xff]  }
 0x687   :  { %2737 = vmatprep.subr.bf16.mxu0 %v3104_v2 }
 0x68a   :  { %2738 = vmatpush3.bf16.msra.mxu0 %v3016_v18  ;;  %v3031_v18 = vld [vmem:[%s3802_s3 + $0x70] sm:$0xff]  }
 0x68b   :  { %2739 = vmatprep.subr.bf16.mxu0 %v3104_v2 }
 0x68e   :  { %2740 = vmatpush3.bf16.msra.mxu0 %v3017_v19 }
 0x68f   :  { %2783 = vmatprep.subr.bf16.mxu0 %v3104_v2 }
 0x731   :  { %v2723_v21 = vpop.f32.mrf.mxu0 }
 0x733   :  { %v773_v22 = vpop.f32.mrf.mxu0 }
 0x735   :  { %v2724_v24 = vpop.f32.mrf.mxu0 }
 0x736   :  { %v2971_v25 = vpack.i.bf16 %v2724_v24, %v2723_v21 }
 0x737   :  { %v776_v31 = vpop.f32.mrf.mxu0 }
 0x738   :  { %2972 = vrot.lane.b32.xlu0 %v2971_v25, %s3107_s30 }
 0x7aa   :  { %v2973_v26 = vpop.permute.xlu0 %2972 }
 0x7ab   :  { %v2975_v27 = vunpack.i.h.bf16 %v2973_v26  ;;  %v2974_v29 = vunpack.i.l.bf16 %v2973_v26 }
 0x7ad   :  { %v796_v32 = vsel %vm257_vm7, %v773_v22, %v2974_v29  ;;  %v797_v33 = vsel %vm257_vm7, %v776_v31, %v2975_v27  ;;  %v3032_v27 = vld [vmem:[%s3802_s3 + $0x68] sm:$0xff]   ;;  %v3033_v29 = vld [vmem:[%s3802_s3 + $0x60] sm:$0xff]   ;;  %v1027_v31 = vrot.slane %v3426_v39, %v3346_v51 }
 0x7ae   :  { %v798_v35 = vpack.c.bf16 %v797_v33, %v796_v32 }
 0x7b0   :  { %2742 = vmatmul.mubr.bf16.vlgmr.msra.gmra.mxu0 %v798_v35 }
 0x7b1   :  { %2791 = vmatprep.mubr.msk.bf16.mxu0 %vm3105_vm1, %v3104_v2  ;;  %2784 = vmatpush3.bf16.msra.mxu0 %v3030_v16 }
 0x7b2   :  { %2785 = vmatprep.subr.bf16.mxu0 %v3104_v2 }
 0x7b5   :  { %2786 = vmatpush3.bf16.msra.mxu0 %v3031_v18 }
 0x7b6   :  { %2787 = vmatprep.subr.bf16.mxu0 %v3104_v2 }
 0x7b9   :  { %2788 = vmatpush3.bf16.msra.mxu0 %v3032_v27 }
 0x7ba   :  { %2789 = vmatprep.subr.bf16.mxu0 %v3104_v2 }
 0x7bd   :  { %2790 = vmatpush3.bf16.msra.mxu0 %v3033_v29 }
 0x870   :  { %v887_v42 = vpop.f32.mrf.mxu0 }
 0x871   :  { %v888_v43 = vadd.f32 %v887_v42, %v803_v41  ;;  %v1121_v41 = vrot.slane %v3426_v39, %v3354_v1  ;;  %v3035_v39 = vld [vmem:[%s3801_s2 + $0x130] sm:$0xff]  }
 0x872   :  { %v2743_v45 = vpop.f32.mrf.mxu0 }
 0x873   :  { %v898_v48 = vadd.f32 %v897_v44, %v888_v43 }
 0x874   :  { %v890_v47 = vpop.f32.mrf.mxu0 }
 0x875   :  { %v891_v49 = vadd.f32 %v890_v47, %v804_v46  ;;  %v900_v53 = vmax.f32 %v898_v48, 0.0 }
 0x876   :  { %v2744_v50 = vpop.f32.mrf.mxu0 }
 0x877   :  { %v899_v52 = vadd.f32 %v897_v44, %v891_v49 }
 0x879   :  { %v901_v54 = vmax.f32 %v899_v52, 0.0  ;;  %v3036_v52 = vld [vmem:[%s3801_s2 + $0x128] sm:$0xff]  }
 0x87b   :  { %v902_v55 = vpack.c.bf16 %v901_v54, %v900_v53  ;;  %v3037_v53 = vld [vmem:[%s3801_s2 + $0x120] sm:$0xff]   ;;  %v3038_v54 = vld [vmem:[%s3801_s2 + $0x118] sm:$0xff]  }
 0x87d   :  { %2754 = vmatmul.mubr.msk.bf16.vlgmr.msra.gmra.mxu1 %vm257_vm7, %v902_v55  ;;  %v3039_v55 = vld [vmem:[%s3801_s2 + $0x110] sm:$0xff]  }
 0x87e   :  { %2759 = vmatprep.mubr.msk.bf16.mxu1 %vm3105_vm1, %v3104_v2 }
 0x93d   :  { %v968_v57 = vpop.f32.mrf.mxu1 }
 0x93e   :  { %v969_v62 = vadd.f32 %v968_v57, %v906_v56  ;;  %v3041_v57 = vld [vmem:[%s3801_s2 + $0x100] sm:$0xff]  }
 0x93f   :  { %v2755_v58 = vpop.f32.mrf.mxu1 }
 0x940   :  { %v975_v7 = vmax.f32 %v969_v62, 0.0  ;;  %v3042_v58 = vld [vmem:[%s3802_s3 + $0x98] sm:$0xff]  }
 0x941   :  { %v971_v4 = vpop.f32.mrf.mxu1 }
 0x942   :  { %v972_v5 = vadd.f32 %v971_v4, %v906_v56  ;;  %v3040_v56 = vld [vmem:[%s3801_s2 + $0x108] sm:$0xff]  }
 0x943   :  { %v2756_v6 = vpop.f32.mrf.mxu1 }
 0x944   :  { %v976_v8 = vmax.f32 %v972_v5, 0.0 }
 0x946   :  { %v977_v9 = vpack.c.bf16 %v976_v8, %v975_v7 }
 0x948   :  { %2758 = vmatpush3.bf16.msra.mxu1 %v977_v9 }
 0x949   :  { %2763 = vmatprep.subr.bf16.mxu1 %v3104_v2 }
 0x94b   :  { %2760 = vmatmul.mubr.msk.bf16.vlgmr.msra.gmra.mxu1 %vm466_vm8, %v3286_v30 }
 0x94c   :  { %2779 = vmatprep.mubr.msk.bf16.mxu1 %vm3105_vm1, %v3104_v2  ;;  %2764 = vmatpush3.bf16.msra.mxu1 %v3022_v11 }
 0x94d   :  { %2765 = vmatprep.subr.bf16.mxu1 %v3104_v2 }
 0x950   :  { %2766 = vmatpush3.bf16.msra.mxu1 %v3023_v12 }
 0x951   :  { %2767 = vmatprep.subr.bf16.mxu1 %v3104_v2 }
 0x954   :  { %2768 = vmatpush3.bf16.msra.mxu1 %v3024_v59 }
 0x955   :  { %2769 = vmatprep.subr.bf16.mxu1 %v3104_v2 }
 0x958   :  { %2770 = vmatpush3.bf16.msra.mxu1 %v3025_v28 }
 0x959   :  { %2771 = vmatprep.subr.bf16.mxu1 %v3104_v2 }
 0x95c   :  { %2772 = vmatpush3.bf16.msra.mxu1 %v3026_v61  ;;  %v3043_v61 = vld [vmem:[%s3802_s3 + $0x90] sm:$0xff]  }
 0x95d   :  { %2773 = vmatprep.subr.bf16.mxu1 %v3104_v2 }
 0x960   :  { %2774 = vmatpush3.bf16.msra.mxu1 %v3027_v13  ;;  %v3044_v13 = vld [vmem:[%s3802_s3 + $0x88] sm:$0xff]  }
 0x961   :  { %2775 = vmatprep.subr.bf16.mxu1 %v3104_v2 }
 0x964   :  { %2776 = vmatpush3.bf16.msra.mxu1 %v3028_v14  ;;  %v3045_v14 = vld [vmem:[%s3802_s3 + $0x80] sm:$0xff]  }
 0x965   :  { %2777 = vmatprep.subr.bf16.mxu1 %v3104_v2 }
 0x968   :  { %2778 = vmatpush3.bf16.msra.mxu1 %v3029_v15  ;;  %v3571_v15 = vld [vmem:[%s3803_s4 + $0x10] sm:$0x1f] }
 0x969   :  { %2821 = vmatprep.subr.bf16.mxu1 %v3104_v2  ;;  %v1310_v16 = vrot.slane %v3571_v15, %v3258_v60 }
 0x96b   :  { %v1311_v18 = vmul.f32 %v1310_v16, %v3267_v63 }
 0xa0b   :  { %v1012_v19 = vpop.f32.mrf.mxu1 }
 0xa0c   :  { %1019 = vrot.lane.b32.xlu0 %v1012_v19, %s3107_s30 }
 0xa0d   :  { %v2761_v20 = vpop.f32.mrf.mxu1 }
 0xa0f   :  { %v1015_v21 = vpop.f32.mrf.mxu1 }
 0xa10   :  { %v1405_v21 = vrot.slane %v3571_v15, %v3270_v0 }
 0xa11   :  { %v2762_v22 = vpop.f32.mrf.mxu1 }
 0xa7e   :  { %v1020_v24 = vpop.permute.xlu0 %1019 }
 0xa7f   :  { %v1022_v25 = vsel %vm257_vm7, %v3359_v10, %v1020_v24  ;;  %v1312_v24 = vmul.f32 %v1310_v16, %v3273_v3 }
 0xa80   :  { %v1023_v26 = vpack.c.bf16 %v1022_v25, %v1022_v25 }
 0xa82   :  { %2780 = vmatmul.mubr.bf16.vlgmr.msra.gmra.mxu1 %v1023_v26 }
 0xa83   :  { %2829 = vmatprep.mubr.msk.bf16.mxu1 %vm3105_vm1, %v3104_v2  ;;  %2822 = vmatpush3.bf16.msra.mxu1 %v3042_v58 }
 0xa84   :  { %2823 = vmatprep.subr.bf16.mxu1 %v3104_v2 }
 0xa87   :  { %2824 = vmatpush3.bf16.msra.mxu1 %v3043_v61 }
 0xa88   :  { %2825 = vmatprep.subr.bf16.mxu1 %v3104_v2 }
 0xa8b   :  { %2826 = vmatpush3.bf16.msra.mxu1 %v3044_v13 }
 0xa8c   :  { %2827 = vmatprep.subr.bf16.mxu1 %v3104_v2 }
 0xa8f   :  { %2828 = vmatpush3.bf16.msra.mxu1 %v3045_v14 }
 0xa90   :  { %2833 = vmatprep.subr.bf16.mxu1 %v3104_v2 }
 0xb42   :  { %v1110_v32 = vpop.f32.mrf.mxu1 }
 0xb43   :  { %v1111_v33 = vadd.f32 %v1110_v32, %v1027_v31 }
 0xb44   :  { %v2781_v35 = vpop.f32.mrf.mxu1 }
 0xb45   :  { %v1116_v36 = vmax.f32 %v1111_v33, 0.0 }
 0xb46   :  { %v1113_v37 = vpop.f32.mrf.mxu1 }
 0xb47   :  { %v1117_v38 = vpack.c.bf16 %v1116_v36, %v1116_v36  ;;  %v1414_v36 = vrot.slane %v3571_v15, %v3282_v17 }
 0xb48   :  { %v2782_v40 = vpop.f32.mrf.mxu1 }
 0xb49   :  { %2792 = vmatmul.mubr.msk.bf16.vlgmr.msra.gmra.mxu0 %vm257_vm7, %v1117_v38 }
 0xb4a   :  { %2797 = vmatprep.mubr.msk.bf16.mxu0 %vm32_vm0, %v3175_v23 }
 0xc09   :  { %v1183_v42 = vpop.f32.mrf.mxu0 }
 0xc0a   :  { %v1184_v43 = vadd.f32 %v1183_v42, %v1121_v41 }
 0xc0b   :  { %v2793_v44 = vpop.f32.mrf.mxu0 }
 0xc0c   :  { %v1189_v45 = vmax.f32 %v1184_v43, 0.0 }
 0xc0d   :  { %v1186_v46 = vpop.f32.mrf.mxu0 }
 0xc0e   :  { %v3504_v47 = vadd.f32 %v1189_v45, %v3359_v10  ;;  %v3034_v10 = vld [vmem:[%s3801_s2 + $0x138] sm:$0xff]  }
 0xc0f   :  { %v2794_v48 = vpop.f32.mrf.mxu0 }
 0xc10   :  { %v1243_v49 = vpack.c.bf16 %v3504_v47, %v3504_v47  ;;  %v3046_v48 = vld [vmem:[%s3801_s2 + $0x178] sm:$0xff]  }
 0xc12   :  { %2949 = vmatprep.subr.msk.bf16.mxu0 %vm196_vm6, %v1243_v49  ;;  %v1245_v50 = vsel %vm196_vm6, %v1243_v49, 0  ;;  %v3047_v49 = vld [vmem:[%s3801_s2 + $0x170] sm:$0xff]  }
 0xc13   :  { %2796 = vmatpush3.bf16.msra.mxu0 %v1245_v50  ;;  %v3048_v50 = vld [vmem:[%s3801_s2 + $0x168] sm:$0xff]  }
 0xc14   :  { %2801 = vmatprep.subr.bf16.mxu0 %v3104_v2 }
 0xc16   :  { %2798 = vmatmul.mubr.msk.bf16.vlgmr.msra.gmra.mxu0 %vm32_vm0, %v3191_v34 }
 0xc17   :  { %2817 = vmatprep.mubr.msk.bf16.mxu0 %vm3105_vm1, %v3104_v2  ;;  %2802 = vmatpush3.bf16.msra.mxu0 %v3034_v10  ;;  %v3049_v10 = vld [vmem:[%s3801_s2 + $0x160] sm:$0xff]  }
 0xc18   :  { %2803 = vmatprep.subr.bf16.mxu0 %v3104_v2 }
 0xc1b   :  { %2804 = vmatpush3.bf16.msra.mxu0 %v3035_v39  ;;  %v3050_v39 = vld [vmem:[%s3801_s2 + $0x158] sm:$0xff]  }
 0xc1c   :  { %2805 = vmatprep.subr.bf16.mxu0 %v3104_v2 }
 0xc1f   :  { %2806 = vmatpush3.bf16.msra.mxu0 %v3036_v52  ;;  %v3051_v52 = vld [vmem:[%s3801_s2 + $0x150] sm:$0xff]  }
 0xc20   :  { %2807 = vmatprep.subr.bf16.mxu0 %v3104_v2 }
 0xc23   :  { %2808 = vmatpush3.bf16.msra.mxu0 %v3037_v53  ;;  %v3052_v53 = vld [vmem:[%s3801_s2 + $0x148] sm:$0xff]  }
 0xc24   :  { %2809 = vmatprep.subr.bf16.mxu0 %v3104_v2 }
 0xc27   :  { %2810 = vmatpush3.bf16.msra.mxu0 %v3038_v54  ;;  %v3053_v54 = vld [vmem:[%s3801_s2 + $0x140] sm:$0xff]  }
 0xc28   :  { %2811 = vmatprep.subr.bf16.mxu0 %v3104_v2 }
 0xc2b   :  { %2812 = vmatpush3.bf16.msra.mxu0 %v3039_v55  ;;  %v3054_v55 = vld [vmem:[%s3802_s3 + $0xb8] sm:$0xff]  }
 0xc2c   :  { %2813 = vmatprep.subr.bf16.mxu0 %v3104_v2 }
 0xc2f   :  { %2814 = vmatpush3.bf16.msra.mxu0 %v3040_v56  ;;  %v3055_v56 = vld [vmem:[%s3802_s3 + $0xb0] sm:$0xff]  }
 0xc30   :  { %2815 = vmatprep.subr.bf16.mxu0 %v3104_v2 }
 0xc33   :  { %2816 = vmatpush3.bf16.msra.mxu0 %v3041_v57 }
 0xc34   :  { %2859 = vmatprep.subr.bf16.mxu0 %v3104_v2 }
 0xcd6   :  { %v2799_v62 = vpop.f32.mrf.mxu0 }
 0xcd8   :  { %v1281_v4 = vpop.f32.mrf.mxu0 }
 0xcda   :  { %v2800_v5 = vpop.f32.mrf.mxu0 }
 0xcdb   :  { %v2976_v6 = vpack.i.bf16 %v2800_v5, %v2799_v62 }
 0xcdc   :  { %v1284_v11 = vpop.f32.mrf.mxu0 }
 0xcdd   :  { %2977 = vrot.lane.b32.xlu0 %v2976_v6, %s3107_s30 }
 0xd4f   :  { %v2978_v7 = vpop.permute.xlu0 %2977 }
 0xd50   :  { %v2980_v8 = vunpack.i.h.bf16 %v2978_v7  ;;  %v2979_v9 = vunpack.i.l.bf16 %v2978_v7 }
 0xd52   :  { %v1304_v12 = vsel %vm257_vm7, %v1281_v4, %v2979_v9  ;;  %v1305_v59 = vsel %vm257_vm7, %v1284_v11, %v2980_v8  ;;  %v3056_v8 = vld [vmem:[%s3802_s3 + $0xa8] sm:$0xff]   ;;  %v3057_v9 = vld [vmem:[%s3802_s3 + $0xa0] sm:$0xff]   ;;  %v1535_v11 = vrot.slane %v3571_v15, %v3346_v51 }
 0xd53   :  { %v1306_v28 = vpack.c.bf16 %v1305_v59, %v1304_v12 }
 0xd55   :  { %2818 = vmatmul.mubr.bf16.vlgmr.msra.gmra.mxu0 %v1306_v28 }
 0xd56   :  { %2867 = vmatprep.mubr.msk.bf16.mxu0 %vm3105_vm1, %v3104_v2  ;;  %2860 = vmatpush3.bf16.msra.mxu0 %v3054_v55 }
 0xd57   :  { %2861 = vmatprep.subr.bf16.mxu0 %v3104_v2 }
 0xd5a   :  { %2862 = vmatpush3.bf16.msra.mxu0 %v3055_v56 }
 0xd5b   :  { %2863 = vmatprep.subr.bf16.mxu0 %v3104_v2 }
 0xd5e   :  { %2864 = vmatpush3.bf16.msra.mxu0 %v3056_v8 }
 0xd5f   :  { %2865 = vmatprep.subr.bf16.mxu0 %v3104_v2 }
 0xd62   :  { %2866 = vmatpush3.bf16.msra.mxu0 %v3057_v9 }
 0xe15   :  { %v1395_v19 = vpop.f32.mrf.mxu0 }
 0xe16   :  { %v1396_v20 = vadd.f32 %v1395_v19, %v1311_v18  ;;  %v1629_v18 = vrot.slane %v3571_v15, %v3354_v1  ;;  %v3060_v15 = vld [vmem:[%s3801_s2 + $0x1a8] sm:$0xff]  }
 0xe17   :  { %v2819_v22 = vpop.f32.mrf.mxu0 }
 0xe18   :  { %v1406_v26 = vadd.f32 %v1405_v21, %v1396_v20 }
 0xe19   :  { %v1398_v25 = vpop.f32.mrf.mxu0 }
 0xe1a   :  { %v1399_v27 = vadd.f32 %v1398_v25, %v1312_v24  ;;  %v1408_v32 = vmax.f32 %v1406_v26, 0.0 }
 0xe1b   :  { %v2820_v29 = vpop.f32.mrf.mxu0 }
 0xe1c   :  { %v1407_v31 = vadd.f32 %v1405_v21, %v1399_v27 }
 0xe1e   :  { %v1409_v33 = vmax.f32 %v1407_v31, 0.0  ;;  %v3062_v31 = vld [vmem:[%s3801_s2 + $0x198] sm:$0xff]  }
 0xe20   :  { %v1410_v35 = vpack.c.bf16 %v1409_v33, %v1408_v32  ;;  %v3063_v32 = vld [vmem:[%s3801_s2 + $0x190] sm:$0xff]   ;;  %v3064_v33 = vld [vmem:[%s3801_s2 + $0x188] sm:$0xff]  }
 0xe22   :  { %2830 = vmatmul.mubr.msk.bf16.vlgmr.msra.gmra.mxu1 %vm257_vm7, %v1410_v35  ;;  %v3065_v35 = vld [vmem:[%s3801_s2 + $0x180] sm:$0xff]  }
 0xe23   :  { %2835 = vmatprep.mubr.msk.bf16.mxu1 %vm3105_vm1, %v3104_v2 }
 0xee2   :  { %v1476_v37 = vpop.f32.mrf.mxu1 }
 0xee3   :  { %v1477_v40 = vadd.f32 %v1476_v37, %v1414_v36 }
 0xee4   :  { %v2831_v38 = vpop.f32.mrf.mxu1 }
 0xee5   :  { %v1483_v44 = vmax.f32 %v1477_v40, 0.0 }
 0xee6   :  { %v1479_v41 = vpop.f32.mrf.mxu1 }
 0xee7   :  { %v1480_v42 = vadd.f32 %v1479_v41, %v1414_v36  ;;  %v3066_v36 = vld [vmem:[%s3802_s3 + $0xd8] sm:$0xff]  }
 0xee8   :  { %v2832_v43 = vpop.f32.mrf.mxu1 }
 0xee9   :  { %v1484_v45 = vmax.f32 %v1480_v42, 0.0 }
 0xeeb   :  { %v1485_v46 = vpack.c.bf16 %v1484_v45, %v1483_v44 }
 0xeed   :  { %2834 = vmatpush3.bf16.msra.mxu1 %v1485_v46 }
 0xeee   :  { %2839 = vmatprep.subr.bf16.mxu1 %v3104_v2 }
 0xef0   :  { %2836 = vmatmul.mubr.msk.bf16.vlgmr.msra.gmra.mxu1 %vm466_vm8, %v3286_v30 }
 0xef1   :  { %2855 = vmatprep.mubr.msk.bf16.mxu1 %vm3105_vm1, %v3104_v2  ;;  %2840 = vmatpush3.bf16.msra.mxu1 %v3046_v48 }
 0xef2   :  { %2841 = vmatprep.subr.bf16.mxu1 %v3104_v2 }
 0xef5   :  { %2842 = vmatpush3.bf16.msra.mxu1 %v3047_v49 }
 0xef6   :  { %2843 = vmatprep.subr.bf16.mxu1 %v3104_v2 }
 0xef9   :  { %2844 = vmatpush3.bf16.msra.mxu1 %v3048_v50  ;;  %v3067_v50 = vld [vmem:[%s3802_s3 + $0xd0] sm:$0xff]  }
 0xefa   :  { %2845 = vmatprep.subr.bf16.mxu1 %v3104_v2 }
 0xefd   :  { %2846 = vmatpush3.bf16.msra.mxu1 %v3049_v10  ;;  %v3068_v10 = vld [vmem:[%s3802_s3 + $0xc8] sm:$0xff]  }
 0xefe   :  { %2847 = vmatprep.subr.bf16.mxu1 %v3104_v2 }
 0xf01   :  { %2848 = vmatpush3.bf16.msra.mxu1 %v3050_v39  ;;  %v3069_v39 = vld [vmem:[%s3802_s3 + $0xc0] sm:$0xff]  }
 0xf02   :  { %2849 = vmatprep.subr.bf16.mxu1 %v3104_v2 }
 0xf05   :  { %2850 = vmatpush3.bf16.msra.mxu1 %v3051_v52  ;;  %v3716_v52 = vld [vmem:[%s3803_s4 + $0x18] sm:$0x1f]  ;;  %s2231_s4 = sshll.u32 %s3108_s14, 4  ;;  %s2232_s4 = int_to_ptr.vmem [resolvable:$true] %s2231_s4 }
 0xf06   :  { %2851 = vmatprep.subr.bf16.mxu1 %v3104_v2  ;;  %s3082_s15 = scalar_lea.vmem %s2232_s4, 16  ;;  %s3086_s16 = scalar_lea.vmem %s2232_s4, 32 }
 0xf07   :  { %p3083_p0 = scmp.ne.s32.totalorder %s2232_s4, %s3082_s15  ;;  %p3087_p1 = scmp.lt.s32.totalorder %s2232_s4, %s2232_s4 }
 0xf08   :  { %p3088_p2 = scmp.lt.s32.totalorder %s3086_s16, %s3082_s15 }
 0xf09   :  { %2852 = vmatpush3.bf16.msra.mxu1 %v3052_v53  ;;  %v1818_v53 = vrot.slane %v3716_v52, %v3258_v60  ;;  %v1922_v60 = vrot.slane %v3716_v52, %v3282_v17  ;;  %v3070_v17 = vld [vmem:[%s3801_s2 + $0x1f8] sm:$0xff]  }
 0xf0a   :  { %2853 = vmatprep.subr.bf16.mxu1 %v3104_v2  ;;  %p3089_p3 = por %p3088_p2, %p3087_p1 }
 0xf0c   :  { %p3090_p4 = pnand %p3089_p3, %p3083_p0 }
 0xf0d   :  { %2854 = vmatpush3.bf16.msra.mxu1 %v3053_v54  ;;  %v1819_v54 = vmul.f32 %v1818_v53, %v3267_v63 }
 0xf0e   :  { %2897 = vmatprep.subr.bf16.mxu1 %v3104_v2 }
 0xfb0   :  { %v1520_v57 = vpop.f32.mrf.mxu1 }
 0xfb1   :  { %1527 = vrot.lane.b32.xlu0 %v1520_v57, %s3107_s30  ;;  %v1913_v57 = vrot.slane %v3716_v52, %v3270_v0 }
 0xfb2   :  { %v2837_v58 = vpop.f32.mrf.mxu1 }
 0xfb4   :  { %v1523_v62 = vpop.f32.mrf.mxu1 }
 0xfb5   :  { %v1820_v62 = vmul.f32 %v1818_v53, %v3273_v3 }
 0xfb6   :  { %v2838_v4 = vpop.f32.mrf.mxu1 }
0x1023   :  { %v1528_v5 = vpop.permute.xlu0 %1527 }
0x1024   :  { %v1530_v6 = vsel %vm257_vm7, %v3504_v47, %v1528_v5 }
0x1025   :  { %v1531_v7 = vpack.c.bf16 %v1530_v6, %v1530_v6 }
0x1027   :  { %2856 = vmatmul.mubr.bf16.vlgmr.msra.gmra.mxu1 %v1531_v7 }
0x1028   :  { %2905 = vmatprep.mubr.msk.bf16.mxu1 %vm3105_vm1, %v3104_v2  ;;  %2898 = vmatpush3.bf16.msra.mxu1 %v3066_v36  ;;  %v2043_v36 = vrot.slane %v3716_v52, %v3346_v51 }
0x1029   :  { %2899 = vmatprep.subr.bf16.mxu1 %v3104_v2 }
0x102c   :  { %2900 = vmatpush3.bf16.msra.mxu1 %v3067_v50 }
0x102d   :  { %2901 = vmatprep.subr.bf16.mxu1 %v3104_v2 }
0x1030   :  { %2902 = vmatpush3.bf16.msra.mxu1 %v3068_v10 }
0x1031   :  { %2903 = vmatprep.subr.bf16.mxu1 %v3104_v2 }
0x1034   :  { %2904 = vmatpush3.bf16.msra.mxu1 %v3069_v39 }
0x1035   :  { %2909 = vmatprep.subr.bf16.mxu1 %v3104_v2 }
0x10e7   :  { %v1618_v12 = vpop.f32.mrf.mxu1 }
0x10e8   :  { %v1619_v59 = vadd.f32 %v1618_v12, %v1535_v11 }
0x10e9   :  { %v2857_v28 = vpop.f32.mrf.mxu1 }
0x10ea   :  { %v1624_v61 = vmax.f32 %v1619_v59, 0.0 }
0x10eb   :  { %v1621_v13 = vpop.f32.mrf.mxu1 }
0x10ec   :  { %v1625_v14 = vpack.c.bf16 %v1624_v61, %v1624_v61 }
0x10ed   :  { %v2858_v16 = vpop.f32.mrf.mxu1 }
0x10ee   :  { %2868 = vmatmul.mubr.msk.bf16.vlgmr.msra.gmra.mxu0 %vm257_vm7, %v1625_v14 }
0x10ef   :  { %2873 = vmatprep.mubr.msk.bf16.mxu0 %vm32_vm0, %v3175_v23  ;;  %v3058_v23 = vld [vmem:[%s3801_s2 + $0x1b8] sm:$0xff]  }
0x11ae   :  { %v1691_v19 = vpop.f32.mrf.mxu0 }
0x11af   :  { %v1692_v20 = vadd.f32 %v1691_v19, %v1629_v18  ;;  %v3071_v18 = vld [vmem:[%s3801_s2 + $0x1f0] sm:$0xff]   ;;  %v3072_v19 = vld [vmem:[%s3801_s2 + $0x1e8] sm:$0xff]  }
0x11b0   :  { %v2869_v21 = vpop.f32.mrf.mxu0 }
0x11b1   :  { %v1697_v22 = vmax.f32 %v1692_v20, 0.0  ;;  %v3074_v20 = vld [vmem:[%s3801_s2 + $0x1d8] sm:$0xff]   ;;  %v3075_v21 = vld [vmem:[%s3801_s2 + $0x1d0] sm:$0xff]  }
0x11b2   :  { %v1694_v24 = vpop.f32.mrf.mxu0 }
0x11b3   :  { %v3649_v25 = vadd.f32 %v1697_v22, %v3504_v47  ;;  %v3059_v47 = vld [vmem:[%s3801_s2 + $0x1b0] sm:$0xff]   ;;  %v3076_v22 = vld [vmem:[%s3801_s2 + $0x1c8] sm:$0xff]   ;;  %v3077_v24 = vld [vmem:[%s3801_s2 + $0x1c0] sm:$0xff]  }
0x11b4   :  { %v2870_v26 = vpop.f32.mrf.mxu0 }
0x11b5   :  { %v1751_v27 = vpack.c.bf16 %v3649_v25, %v3649_v25  ;;  %v3078_v26 = vld [vmem:[%s3802_s3 + $0xf8] sm:$0xff]  }
0x11b7   :  { %2950 = vmatprep.subr.msk.bf16.mxu0 %vm196_vm6, %v1751_v27  ;;  %v1753_v29 = vsel %vm196_vm6, %v1751_v27, 0  ;;  %v3079_v27 = vld [vmem:[%s3802_s3 + $0xf0] sm:$0xff]  }
0x11b8   :  { %2872 = vmatpush3.bf16.msra.mxu0 %v1753_v29 }
0x11b9   :  { %2877 = vmatprep.subr.bf16.mxu0 %v3104_v2 }
0x11bb   :  { %2874 = vmatmul.mubr.msk.bf16.vlgmr.msra.gmra.mxu0 %vm32_vm0, %v3191_v34  ;;  %v3061_v34 = vld [vmem:[%s3801_s2 + $0x1a0] sm:$0xff]  }
0x11bc   :  { %2893 = vmatprep.mubr.msk.bf16.mxu0 %vm3105_vm1, %v3104_v2  ;;  %2878 = vmatpush3.bf16.msra.mxu0 %v3058_v23 }
0x11bd   :  { %2879 = vmatprep.subr.bf16.mxu0 %v3104_v2 }
0x11c0   :  { %2880 = vmatpush3.bf16.msra.mxu0 %v3059_v47 }
0x11c1   :  { %2881 = vmatprep.subr.bf16.mxu0 %v3104_v2 }
0x11c4   :  { %2882 = vmatpush3.bf16.msra.mxu0 %v3060_v15 }
0x11c5   :  { %2883 = vmatprep.subr.bf16.mxu0 %v3104_v2 }
0x11c8   :  { %2884 = vmatpush3.bf16.msra.mxu0 %v3061_v34 }
0x11c9   :  { %2885 = vmatprep.subr.bf16.mxu0 %v3104_v2 }
0x11cc   :  { %2886 = vmatpush3.bf16.msra.mxu0 %v3062_v31 }
0x11cd   :  { %2887 = vmatprep.subr.bf16.mxu0 %v3104_v2 }
0x11d0   :  { %2888 = vmatpush3.bf16.msra.mxu0 %v3063_v32 }
0x11d1   :  { %2889 = vmatprep.subr.bf16.mxu0 %v3104_v2 }
0x11d4   :  { %2890 = vmatpush3.bf16.msra.mxu0 %v3064_v33  ;;  %v3080_v33 = vld [vmem:[%s3802_s3 + $0xe8] sm:$0xff]  }
0x11d5   :  { %2891 = vmatprep.subr.bf16.mxu0 %v3104_v2 }
0x11d8   :  { %2892 = vmatpush3.bf16.msra.mxu0 %v3065_v35  ;;  %v3081_v35 = vld [vmem:[%s3802_s3 + $0xe0] sm:$0xff]  }
0x11d9   :  { %2935 = vmatprep.subr.bf16.mxu0 %v3104_v2 }
0x127b   :  { %v2875_v37 = vpop.f32.mrf.mxu0 }
0x127d   :  { %v1789_v38 = vpop.f32.mrf.mxu0 }
0x127f   :  { %v2876_v40 = vpop.f32.mrf.mxu0 }
0x1280   :  { %v2981_v41 = vpack.i.bf16 %v2876_v40, %v2875_v37 }
0x1281   :  { %v1792_v45 = vpop.f32.mrf.mxu0 }
0x1282   :  { %2982 = vrot.lane.b32.xlu0 %v2981_v41, %s3107_s30 }
0x12f4   :  { %v2983_v42 = vpop.permute.xlu0 %2982 }
0x12f5   :  { %v2985_v43 = vunpack.i.h.bf16 %v2983_v42  ;;  %v2984_v44 = vunpack.i.l.bf16 %v2983_v42 }
0x12f7   :  { %v1812_v46 = vsel %vm257_vm7, %v1789_v38, %v2984_v44  ;;  %v1813_v48 = vsel %vm257_vm7, %v1792_v45, %v2985_v43 }
0x12f8   :  { %v1814_v49 = vpack.c.bf16 %v1813_v48, %v1812_v46 }
0x12fa   :  { %2894 = vmatmul.mubr.bf16.vlgmr.msra.gmra.mxu0 %v1814_v49 }
0x12fb   :  { %2943 = vmatprep.mubr.msk.bf16.mxu0 %vm3105_vm1, %v3104_v2  ;;  %2936 = vmatpush3.bf16.msra.mxu0 %v3078_v26 }
0x12fc   :  { %2937 = vmatprep.subr.bf16.mxu0 %v3104_v2 }
0x12ff   :  { %2938 = vmatpush3.bf16.msra.mxu0 %v3079_v27 }
0x1300   :  { %2939 = vmatprep.subr.bf16.mxu0 %v3104_v2 }
0x1303   :  { %2940 = vmatpush3.bf16.msra.mxu0 %v3080_v33 }
0x1304   :  { %2941 = vmatprep.subr.bf16.mxu0 %v3104_v2 }
0x1307   :  { %2942 = vmatpush3.bf16.msra.mxu0 %v3081_v35 }
0x13ba   :  { %v1903_v55 = vpop.f32.mrf.mxu0 }
0x13bb   :  { %v1904_v56 = vadd.f32 %v1903_v55, %v1819_v54 }
0x13bc   :  { %v2895_v58 = vpop.f32.mrf.mxu0 }
0x13bd   :  { %v1914_v5 = vadd.f32 %v1913_v57, %v1904_v56 }
0x13be   :  { %v1906_v4 = vpop.f32.mrf.mxu0 }
0x13bf   :  { %v1907_v6 = vadd.f32 %v1906_v4, %v1820_v62  ;;  %v1916_v9 = vmax.f32 %v1914_v5, 0.0 }
0x13c0   :  { %v2896_v7 = vpop.f32.mrf.mxu0 }
0x13c1   :  { %v1915_v8 = vadd.f32 %v1913_v57, %v1907_v6 }
0x13c3   :  { %v1917_v11 = vmax.f32 %v1915_v8, 0.0 }
0x13c5   :  { %v1918_v12 = vpack.c.bf16 %v1917_v11, %v1916_v9 }
0x13c7   :  { %2906 = vmatmul.mubr.msk.bf16.vlgmr.msra.gmra.mxu1 %vm257_vm7, %v1918_v12 }
0x13c8   :  { %2911 = vmatprep.mubr.msk.bf16.mxu1 %vm3105_vm1, %v3104_v2 }
0x1487   :  { %v1984_v63 = vpop.f32.mrf.mxu1 }
0x1488   :  { %v1985_v59 = vadd.f32 %v1984_v63, %v1922_v60 }
0x1489   :  { %v2907_v0 = vpop.f32.mrf.mxu1 }
0x148a   :  { %v1991_v13 = vmax.f32 %v1985_v59, 0.0 }
0x148b   :  { %v1987_v3 = vpop.f32.mrf.mxu1 }
0x148c   :  { %v1988_v28 = vadd.f32 %v1987_v3, %v1922_v60 }
0x148d   :  { %v2908_v61 = vpop.f32.mrf.mxu1 }
0x148e   :  { %v1992_v14 = vmax.f32 %v1988_v28, 0.0 }
0x1490   :  { %v1993_v16 = vpack.c.bf16 %v1992_v14, %v1991_v13 }
0x1492   :  { %2910 = vmatpush3.bf16.msra.mxu1 %v1993_v16 }
0x1493   :  { %2915 = vmatprep.subr.bf16.mxu1 %v3104_v2 }
0x1495   :  { %2912 = vmatmul.mubr.msk.bf16.vlgmr.msra.gmra.mxu1 %vm466_vm8, %v3286_v30  ;;  %v3073_v30 = vld [vmem:[%s3801_s2 + $0x1e0] sm:$0xff]  }
0x1496   :  { %2931 = vmatprep.mubr.msk.bf16.mxu1 %vm3105_vm1, %v3104_v2  ;;  %2916 = vmatpush3.bf16.msra.mxu1 %v3070_v17 }
0x1497   :  { %2917 = vmatprep.subr.bf16.mxu1 %v3104_v2 }
0x149a   :  { %2918 = vmatpush3.bf16.msra.mxu1 %v3071_v18 }
0x149b   :  { %2919 = vmatprep.subr.bf16.mxu1 %v3104_v2 }
0x149e   :  { %2920 = vmatpush3.bf16.msra.mxu1 %v3072_v19 }
0x149f   :  { %2921 = vmatprep.subr.bf16.mxu1 %v3104_v2 }
0x14a2   :  { %2922 = vmatpush3.bf16.msra.mxu1 %v3073_v30 }
0x14a3   :  { %2923 = vmatprep.subr.bf16.mxu1 %v3104_v2 }
0x14a6   :  { %2924 = vmatpush3.bf16.msra.mxu1 %v3074_v20 }
0x14a7   :  { %2925 = vmatprep.subr.bf16.mxu1 %v3104_v2 }
0x14aa   :  { %2926 = vmatpush3.bf16.msra.mxu1 %v3075_v21 }
0x14ab   :  { %2927 = vmatprep.subr.bf16.mxu1 %v3104_v2 }
0x14ae   :  { %2928 = vmatpush3.bf16.msra.mxu1 %v3076_v22 }
0x14af   :  { %2929 = vmatprep.subr.bf16.mxu1 %v3104_v2  ;;  %v2137_v2 = vrot.slane %v3716_v52, %v3354_v1  ;;  %v2215_v1 = vld [vmem:[%s3804_s5 + $0x10] sm:$0x1] }
0x14b2   :  { %2930 = vmatpush3.bf16.msra.mxu1 %v3077_v24 }
0x1555   :  { %v2028_v29 = vpop.f32.mrf.mxu1 }
0x1556   :  { %2035 = vrot.lane.b32.xlu0 %v2028_v29, %s3107_s30 }
0x1557   :  { %v2913_v23 = vpop.f32.mrf.mxu1 }
0x1559   :  { %v2031_v47 = vpop.f32.mrf.mxu1 }
0x155b   :  { %v2914_v15 = vpop.f32.mrf.mxu1 }
0x15c8   :  { %v2036_v34 = vpop.permute.xlu0 %2035 }
0x15c9   :  { %v2038_v31 = vsel %vm257_vm7, %v3649_v25, %v2036_v34 }
0x15ca   :  { %v2039_v32 = vpack.c.bf16 %v2038_v31, %v2038_v31 }
0x15cc   :  { %2932 = vmatmul.mubr.bf16.vlgmr.msra.gmra.mxu1 %v2039_v32 }
0x168c   :  { %v2126_v37 = vpop.f32.mrf.mxu1 }
0x168d   :  { %v2127_v38 = vadd.f32 %v2126_v37, %v2043_v36 }
0x168e   :  { %v2933_v40 = vpop.f32.mrf.mxu1 }
0x168f   :  { %v2132_v41 = vmax.f32 %v2127_v38, 0.0 }
0x1690   :  { %v2129_v42 = vpop.f32.mrf.mxu1 }
0x1691   :  { %v2133_v43 = vpack.c.bf16 %v2132_v41, %v2132_v41 }
0x1692   :  { %v2934_v44 = vpop.f32.mrf.mxu1 }
0x1693   :  { %2944 = vmatmul.mubr.msk.bf16.vlgmr.msra.gmra.mxu0 %vm257_vm7, %v2133_v43 }
0x1753   :  { %v2199_v45 = vpop.f32.mrf.mxu0 }
0x1754   :  { %v2200_v46 = vadd.f32 %v2199_v45, %v2137_v2 }
0x1755   :  { %v2945_v48 = vpop.f32.mrf.mxu0 }
0x1756   :  { %v2205_v49 = vmax.f32 %v2200_v46, 0.0 }
0x1757   :  { %v2202_v50 = vpop.f32.mrf.mxu0 }
0x1758   :  { %v2206_v10 = vadd.f32 %v2205_v49, %v3649_v25  ;;  %v2216_v25 = vld [vmem:[%s3804_s5 + $0x18] sm:$0x1] }
0x1759   :  { %v2946_v51 = vpop.f32.mrf.mxu0 }
0x175a   :  { %v2207_v39 = vsel %vm257_vm7, %v2206_v10, 0.0 }
0x175b   :  { %v2208_v53 = vrot.slane %v2207_v39, 4 }
0x175d   :  { %v2209_v54 = vadd.f32 %v2208_v53, %v2207_v39 }
0x175f   :  { %v2210_v55 = vrot.slane %v2209_v54, 2 }
0x1761   :  { %v2211_v56 = vadd.f32 %v2210_v55, %v2209_v54 }
0x1763   :  { %v2212_v57 = vrot.slane %v2211_v56, 1 }
0x1765   :  { %v2213_v58 = vadd.f32 %v2212_v57, %v2211_v56 }
0x1767   :  { %v2214_v52 = vmul.f32 0.125, %v2213_v58 }
0x1769   :  { %v2217_v62 = vmul.f32 %v2215_v1, %v2214_v52 }
0x176b   :  { %v2219_v4 = vsel %vm2218_vm9, %v2217_v62, 0.0 }
0x176c   :  { %2220 = vadd.xlane.f32.xlu0 %v2219_v4 }
0x17f5   :  { %v2221_v5 = vpop.xlane.xlu0 %2220 }
0x17f6   :  { %v2222_v6 = vadd.f32 %v2221_v5, %v2216_v25 }
0x17f8   :  { %2224 = vst.msk [vmem:[#allocation2] sm:$0x1] %vm2223_vm10, %v2222_v6 }
0x17f9   :  { %3093 = shalt.err (!%p3090_p4)
}
0x17fa   :  { %2234 = dma.vmem_to_hbm [thread:$0]  %s2232_s4, 16, %s3805_s6, [#allocation3]  }
0x17fb   :  { %3102 = dma.done.wait [#allocation3], 16  }
0x17fc   :  { %3103 = vsyncadd [#allocation3], 4294967280 }
0x17fd   :  { %2238 = vsyncpa [#allocation3], 1 }

</bundles_post_ra>
